<compile_context>
chip_gen: v7x
topology: tpu7x:2x2x1
jax: 0.10.0
libtpu: 0.0.40
codegen_flags: <defaults>
</compile_context>

<pallas_src>
import functools

import jax
import jax.numpy as jnp
from jax.experimental import pallas as pl
from jax.experimental.pallas import tpu as pltpu


def mha_kernel(q_ref, k_ref, v_ref,
               wq_ref, bq_ref, wk_ref, bk_ref, wv_ref, bv_ref,
               wo_ref, bo_ref, o_ref,
               *, nb_heads: int, head_dim: int, block_batch: int):
    """One batch-tile per grid step; heads batched into a single contraction."""
    H, D, BT = nb_heads, head_dim, block_batch
    G = H * BT                            # one attention "group" per (head, batch)

    q3 = q_ref[...]                       # (BT, S, E) bf16
    k3 = k_ref[...]
    v3 = v_ref[...]
    S, E = q3.shape[1], q3.shape[2]

    def rep_heads(x):                     # (BT, S, E) -> (G, S, E); g = h*BT + b
        return jnp.broadcast_to(x, (H,) + x.shape).reshape((G,) + x.shape[1:])

    def rep_batch(w):                     # (H, a, b) -> (G, a, b); g = h*BT + b
        return jnp.broadcast_to(w[:, None], (H, BT) + w.shape[1:]).reshape(
            (G,) + w.shape[1:])

    # --- head-batched Q/K/V projections (contraction dim = E on the MXU;
    #     no per-head lane slicing, no transposes, no concatenates). ----------
    Q = jnp.einsum('gse,ged->gsd', rep_heads(q3), rep_batch(wq_ref[...]),
                   preferred_element_type=jnp.float32) + rep_batch(bq_ref[...])
    K = jnp.einsum('gse,ged->gsd', rep_heads(k3), rep_batch(wk_ref[...]),
                   preferred_element_type=jnp.float32) + rep_batch(bk_ref[...])
    V = jnp.einsum('gse,ged->gsd', rep_heads(v3), rep_batch(wv_ref[...]),
                   preferred_element_type=jnp.float32) + rep_batch(bv_ref[...])

    Qb = Q.astype(jnp.bfloat16)           # 1/sqrt(D) already folded into wq/bq
    Kb = K.astype(jnp.bfloat16)
    Vb = V.astype(jnp.bfloat16)

    # --- scaled-dot attention, batched over (head, batch) groups. ------------
    # Contract the last dims of Q and K directly (no explicit K transpose).
    s = jnp.einsum('gqd,gkd->gqk', Qb, Kb,
                   preferred_element_type=jnp.float32)           # (G, S, S) f32
    m = jnp.max(s, axis=-1, keepdims=True)
    e = jnp.exp(s - m)
    p = e * pl.reciprocal(jnp.sum(e, axis=-1, keepdims=True), approx=True)

    att = jnp.einsum('gqk,gkd->gqd', p.astype(jnp.bfloat16), Vb,
                     preferred_element_type=jnp.float32)         # (G, S, D)

    # --- output projection: concat(heads) @ Wo == sum_h head_h @ Wo[h]. ------
    y = jnp.einsum('gsd,gde->gse', att.astype(jnp.bfloat16),
                   rep_batch(wo_ref[...]),
                   preferred_element_type=jnp.float32)           # (G, S, E)
    y = jnp.sum(y.reshape(H, BT, S, E), axis=0) + bo_ref[...]    # (BT, S, E)
    o_ref[...] = y.astype(o_ref.dtype)


def pack_params(params, nb_heads: int):
    """Host-side repack of math-layout params (x @ W + b) into kernel layout.

    Weights become head-major (H, E, D)/(H, D, E) bf16, biases (H, 1, D) f32,
    and the 1/sqrt(D) attention scale is folded into the Q projection.
    """
    wq, bq, wk, bk, wv, bv, wo, bo = params
    E = wq.shape[0]
    H = nb_heads
    D = E // H
    scale = 1.0 / (float(D) ** 0.5)

    def heads_w(w):                       # (E_in, H*D) -> (H, E_in, D)
        return jnp.transpose(w.reshape(E, H, D), (1, 0, 2))

    def heads_b(b):                       # (1, H*D) -> (H, 1, D)
        return jnp.transpose(b.reshape(1, H, D), (1, 0, 2))

    return (
        (heads_w(wq) * scale).astype(jnp.bfloat16),
        (heads_b(bq) * scale).astype(jnp.float32),
        heads_w(wk).astype(jnp.bfloat16), heads_b(bk).astype(jnp.float32),
        heads_w(wv).astype(jnp.bfloat16), heads_b(bv).astype(jnp.float32),
        wo.reshape(H, D, E).astype(jnp.bfloat16),   # rows are head-major
        bo.astype(jnp.float32),                     # (1, E)
    )


def multi_head_attention(query, key, value, params, *, nb_heads: int,
                         block_batch=None):
    B, S, E = query.shape
    D = E // nb_heads
    if block_batch is None:
        block_batch = B        # tiny problem: whole batch in one grid step
    BT = block_batch
    assert B % BT == 0, "block_batch must divide the batch size"

    wq, bq, wk, bk, wv, bv, wo, bo = pack_params(params, nb_heads)
    q16 = query.astype(jnp.bfloat16)
    k16 = key.astype(jnp.bfloat16)
    v16 = value.astype(jnp.bfloat16)

    kernel = functools.partial(mha_kernel, nb_heads=nb_heads, head_dim=D,
                               block_batch=BT)

    seq_spec = pl.BlockSpec((BT, S, E), lambda b: (b, 0, 0))
    whd_spec = pl.BlockSpec((nb_heads, E, D), lambda b: (0, 0, 0))
    bhd_spec = pl.BlockSpec((nb_heads, 1, D), lambda b: (0, 0, 0))
    wo_spec = pl.BlockSpec((nb_heads, D, E), lambda b: (0, 0, 0))
    bo_spec = pl.BlockSpec((1, E), lambda b: (0, 0))

    return pl.pallas_call(
        kernel,
        out_shape=jax.ShapeDtypeStruct((B, S, E), jnp.float32),
        grid_spec=pltpu.PrefetchScalarGridSpec(
            num_scalar_prefetch=0,
            grid=(B // BT,),
            in_specs=[seq_spec, seq_spec, seq_spec,
                      whd_spec, bhd_spec, whd_spec, bhd_spec, whd_spec, bhd_spec,
                      wo_spec, bo_spec],
            out_specs=pl.BlockSpec((BT, S, E), lambda b: (b, 0, 0)),
        ),
        compiler_params=pltpu.CompilerParams(
            dimension_semantics=("parallel",),
            vmem_limit_bytes=32 * 1024 * 1024),
    )(q16, k16, v16, wq, bq, wk, bk, wv, bv, wo, bo)


def init_params(key, nb_heads: int, embeddings_len: int):
    """Deterministic init matching nn.Linear shapes (math layout: y = x @ W + b).

    Per-head (out=D, in=E) weights are concatenated along the out dim and
    transposed so head h lives in columns [h*D, (h+1)*D).
    """
    E = embeddings_len
    D = E // nb_heads
    ks = jax.random.split(key, 8)

    def lin(k, out_dim, in_dim):
        bound = 1.0 / (in_dim ** 0.5)
        kw, kb = jax.random.split(k)
        w = jax.random.uniform(kw, (out_dim, in_dim), jnp.float32, -bound, bound)
        b = jax.random.uniform(kb, (out_dim,), jnp.float32, -bound, bound)
        return w, b

    def stacked(kbase):
        ws, bs = [], []
        for h in range(nb_heads):
            w, b = lin(jax.random.fold_in(kbase, h), D, E)
            ws.append(w)
            bs.append(b)
        W = jnp.concatenate(ws, axis=0)            # (E_out, E_in)
        bvec = jnp.concatenate(bs, axis=0)         # (E,)
        return W.T, bvec.reshape(1, E)             # (E_in, E_out), (1, E)

    wq, bq = stacked(ks[0])
    wk, bk = stacked(ks[1])
    wv, bv = stacked(ks[2])
    wo_t, bo = lin(ks[3], E, E)
    return (wq, bq, wk, bk, wv, bv, wo_t.T, bo.reshape(1, E))


def reference(query, key, value, params, nb_heads):
    """Pure-JAX f32 reference mirroring the PyTorch module (mask=None)."""
    wq, bq, wk, bk, wv, bv, wo, bo = params
    E = query.shape[-1]
    D = E // nb_heads
    Q = query @ wq + bq
    K = key @ wk + bk
    V = value @ wv + bv
    outs = []
    for h in range(nb_heads):
        sl = slice(h * D, (h + 1) * D)
        e = jnp.einsum('bqd,bkd->bqk', Q[..., sl], K[..., sl]) / (D ** 0.5)
        a = jax.nn.softmax(e, axis=-1)
        outs.append(jnp.einsum('bqk,bkd->bqd', a, V[..., sl]))
    cat = jnp.concatenate(outs, axis=-1)
    return cat @ wo + bo


if __name__ == "__main__":
    nb_heads = 4
    embeddings_len = 32
    B, S = 2, 8

    root = jax.random.PRNGKey(0)
    k_q, k_k, k_v, k_p = jax.random.split(root, 4)
    query = jax.random.normal(k_q, (B, S, embeddings_len), jnp.float32)
    key_t = jax.random.normal(k_k, (B, S, embeddings_len), jnp.float32)
    value = jax.random.normal(k_v, (B, S, embeddings_len), jnp.float32)

    params = init_params(k_p, nb_heads, embeddings_len)

    out = multi_head_attention(query, key_t, value, params, nb_heads=nb_heads)
    out = jax.block_until_ready(out)

    ref = reference(query, key_t, value, params, nb_heads)
    assert out.shape == (B, S, embeddings_len)
    # bf16 matmul inputs (f32 accumulation) -> slightly looser tolerance vs f32 ref.
    err = float(jnp.max(jnp.abs(out - ref)))
    assert jnp.allclose(out, ref, atol=2e-2, rtol=2e-2), f"max abs err {err}"

    print("KERNEL_OK")
</pallas_src>

<mosaic_0001>
module attributes {stable_mosaic.version = 11 : i64} {
  func.func @mha_kernel(%arg0: i32, %arg1: memref<2x8x32xbf16, #tpu.memory_space<vmem>>, %arg2: memref<2x8x32xbf16, #tpu.memory_space<vmem>>, %arg3: memref<2x8x32xbf16, #tpu.memory_space<vmem>>, %arg4: memref<4x32x8xbf16, #tpu.memory_space<vmem>>, %arg5: memref<4x1x8xf32, #tpu.memory_space<vmem>>, %arg6: memref<4x32x8xbf16, #tpu.memory_space<vmem>>, %arg7: memref<4x1x8xf32, #tpu.memory_space<vmem>>, %arg8: memref<4x32x8xbf16, #tpu.memory_space<vmem>>, %arg9: memref<4x1x8xf32, #tpu.memory_space<vmem>>, %arg10: memref<4x8x32xbf16, #tpu.memory_space<vmem>>, %arg11: memref<1x32xf32, #tpu.memory_space<vmem>>, %arg12: memref<2x8x32xf32, #tpu.memory_space<vmem>>) attributes {dimension_semantics = [#tpu.dimension_semantics<parallel>], iteration_bounds = array<i64: 1>, scalar_prefetch = 0 : i64, scratch_operands = 0 : i64, tpu.core_type = #tpu.core_type<tc>, window_params = [{transform_indices = @transform_0, window_bounds = array<i64: 2, 8, 32>}, {transform_indices = @transform_1, window_bounds = array<i64: 2, 8, 32>}, {transform_indices = @transform_2, window_bounds = array<i64: 2, 8, 32>}, {pipeline_mode = #tpu.pipeline_mode<synchronous>, transform_indices = @transform_3, window_bounds = array<i64: 4, 32, 8>}, {pipeline_mode = #tpu.pipeline_mode<synchronous>, transform_indices = @transform_4, window_bounds = array<i64: 4, 1, 8>}, {pipeline_mode = #tpu.pipeline_mode<synchronous>, transform_indices = @transform_5, window_bounds = array<i64: 4, 32, 8>}, {pipeline_mode = #tpu.pipeline_mode<synchronous>, transform_indices = @transform_6, window_bounds = array<i64: 4, 1, 8>}, {pipeline_mode = #tpu.pipeline_mode<synchronous>, transform_indices = @transform_7, window_bounds = array<i64: 4, 32, 8>}, {pipeline_mode = #tpu.pipeline_mode<synchronous>, transform_indices = @transform_8, window_bounds = array<i64: 4, 1, 8>}, {pipeline_mode = #tpu.pipeline_mode<synchronous>, transform_indices = @transform_9, window_bounds = array<i64: 4, 8, 32>}, {pipeline_mode = #tpu.pipeline_mode<synchronous>, transform_indices = @transform_10, window_bounds = array<i64: 1, 32>}, {transform_indices = @transform_11, window_bounds = array<i64: 2, 8, 32>}]} {
    %c0 = arith.constant 0 : index
    %c0_0 = arith.constant 0 : index
    %c0_1 = arith.constant 0 : index
    %0 = vector.load %arg1[%c0, %c0_0, %c0_1] : memref<2x8x32xbf16, #tpu.memory_space<vmem>>, vector<2x8x32xbf16>
    %c0_2 = arith.constant 0 : index
    %c0_3 = arith.constant 0 : index
    %c0_4 = arith.constant 0 : index
    %1 = vector.load %arg2[%c0_2, %c0_3, %c0_4] : memref<2x8x32xbf16, #tpu.memory_space<vmem>>, vector<2x8x32xbf16>
    %c0_5 = arith.constant 0 : index
    %c0_6 = arith.constant 0 : index
    %c0_7 = arith.constant 0 : index
    %2 = vector.load %arg3[%c0_5, %c0_6, %c0_7] : memref<2x8x32xbf16, #tpu.memory_space<vmem>>, vector<2x8x32xbf16>
    %3 = vector.shape_cast %0 : vector<2x8x32xbf16> to vector<1x2x8x32xbf16>
    %4 = vector.broadcast %3 : vector<1x2x8x32xbf16> to vector<4x2x8x32xbf16>
    %5 = vector.shape_cast %4 : vector<4x2x8x32xbf16> to vector<8x8x32xbf16>
    %c0_8 = arith.constant 0 : index
    %c0_9 = arith.constant 0 : index
    %c0_10 = arith.constant 0 : index
    %6 = vector.load %arg4[%c0_8, %c0_9, %c0_10] : memref<4x32x8xbf16, #tpu.memory_space<vmem>>, vector<4x32x8xbf16>
    %7 = vector.shape_cast %6 : vector<4x32x8xbf16> to vector<4x1x32x8xbf16>
    %8 = vector.shape_cast %7 : vector<4x1x32x8xbf16> to vector<4x1x32x8xbf16>
    %9 = vector.broadcast %8 : vector<4x1x32x8xbf16> to vector<4x2x32x8xbf16>
    %10 = vector.shape_cast %9 : vector<4x2x32x8xbf16> to vector<8x32x8xbf16>
    "tpu.trace_start"() <{level = 10 : i32, message = "gse,ged->gsd"}> : () -> ()
    %cst = arith.constant dense<0.000000e+00> : vector<8x8x8xf32>
    %11 = tpu.matmul %5, %10, %cst {dimension_numbers = #tpu.dot_dimension_numbers<[2], [1], [1], [2], [0, 0, 0, 1, 1, 2], [0], [0]>} : vector<8x8x32xbf16>, vector<8x32x8xbf16>, vector<8x8x8xf32> -> vector<8x8x8xf32>
    "tpu.trace_stop"() : () -> ()
    %c0_11 = arith.constant 0 : index
    %c0_12 = arith.constant 0 : index
    %c0_13 = arith.constant 0 : index
    %12 = vector.load %arg5[%c0_11, %c0_12, %c0_13] : memref<4x1x8xf32, #tpu.memory_space<vmem>>, vector<4x1x8xf32>
    %13 = vector.shape_cast %12 : vector<4x1x8xf32> to vector<4x1x1x8xf32>
    %14 = vector.shape_cast %13 : vector<4x1x1x8xf32> to vector<4x1x1x8xf32>
    %15 = vector.broadcast %14 : vector<4x1x1x8xf32> to vector<4x2x1x8xf32>
    %16 = vector.shape_cast %15 : vector<4x2x1x8xf32> to vector<8x1x8xf32>
    %17 = vector.broadcast %16 : vector<8x1x8xf32> to vector<8x8x8xf32>
    %18 = arith.addf %11, %17 : vector<8x8x8xf32>
    %19 = vector.shape_cast %1 : vector<2x8x32xbf16> to vector<1x2x8x32xbf16>
    %20 = vector.broadcast %19 : vector<1x2x8x32xbf16> to vector<4x2x8x32xbf16>
    %21 = vector.shape_cast %20 : vector<4x2x8x32xbf16> to vector<8x8x32xbf16>
    %c0_14 = arith.constant 0 : index
    %c0_15 = arith.constant 0 : index
    %c0_16 = arith.constant 0 : index
    %22 = vector.load %arg6[%c0_14, %c0_15, %c0_16] : memref<4x32x8xbf16, #tpu.memory_space<vmem>>, vector<4x32x8xbf16>
    %23 = vector.shape_cast %22 : vector<4x32x8xbf16> to vector<4x1x32x8xbf16>
    %24 = vector.shape_cast %23 : vector<4x1x32x8xbf16> to vector<4x1x32x8xbf16>
    %25 = vector.broadcast %24 : vector<4x1x32x8xbf16> to vector<4x2x32x8xbf16>
    %26 = vector.shape_cast %25 : vector<4x2x32x8xbf16> to vector<8x32x8xbf16>
    "tpu.trace_start"() <{level = 10 : i32, message = "gse,ged->gsd"}> : () -> ()
    %cst_17 = arith.constant dense<0.000000e+00> : vector<8x8x8xf32>
    %27 = tpu.matmul %21, %26, %cst_17 {dimension_numbers = #tpu.dot_dimension_numbers<[2], [1], [1], [2], [0, 0, 0, 1, 1, 2], [0], [0]>} : vector<8x8x32xbf16>, vector<8x32x8xbf16>, vector<8x8x8xf32> -> vector<8x8x8xf32>
    "tpu.trace_stop"() : () -> ()
    %c0_18 = arith.constant 0 : index
    %c0_19 = arith.constant 0 : index
    %c0_20 = arith.constant 0 : index
    %28 = vector.load %arg7[%c0_18, %c0_19, %c0_20] : memref<4x1x8xf32, #tpu.memory_space<vmem>>, vector<4x1x8xf32>
    %29 = vector.shape_cast %28 : vector<4x1x8xf32> to vector<4x1x1x8xf32>
    %30 = vector.shape_cast %29 : vector<4x1x1x8xf32> to vector<4x1x1x8xf32>
    %31 = vector.broadcast %30 : vector<4x1x1x8xf32> to vector<4x2x1x8xf32>
    %32 = vector.shape_cast %31 : vector<4x2x1x8xf32> to vector<8x1x8xf32>
    %33 = vector.broadcast %32 : vector<8x1x8xf32> to vector<8x8x8xf32>
    %34 = arith.addf %27, %33 : vector<8x8x8xf32>
    %35 = vector.shape_cast %2 : vector<2x8x32xbf16> to vector<1x2x8x32xbf16>
    %36 = vector.broadcast %35 : vector<1x2x8x32xbf16> to vector<4x2x8x32xbf16>
    %37 = vector.shape_cast %36 : vector<4x2x8x32xbf16> to vector<8x8x32xbf16>
    %c0_21 = arith.constant 0 : index
    %c0_22 = arith.constant 0 : index
    %c0_23 = arith.constant 0 : index
    %38 = vector.load %arg8[%c0_21, %c0_22, %c0_23] : memref<4x32x8xbf16, #tpu.memory_space<vmem>>, vector<4x32x8xbf16>
    %39 = vector.shape_cast %38 : vector<4x32x8xbf16> to vector<4x1x32x8xbf16>
    %40 = vector.shape_cast %39 : vector<4x1x32x8xbf16> to vector<4x1x32x8xbf16>
    %41 = vector.broadcast %40 : vector<4x1x32x8xbf16> to vector<4x2x32x8xbf16>
    %42 = vector.shape_cast %41 : vector<4x2x32x8xbf16> to vector<8x32x8xbf16>
    "tpu.trace_start"() <{level = 10 : i32, message = "gse,ged->gsd"}> : () -> ()
    %cst_24 = arith.constant dense<0.000000e+00> : vector<8x8x8xf32>
    %43 = tpu.matmul %37, %42, %cst_24 {dimension_numbers = #tpu.dot_dimension_numbers<[2], [1], [1], [2], [0, 0, 0, 1, 1, 2], [0], [0]>} : vector<8x8x32xbf16>, vector<8x32x8xbf16>, vector<8x8x8xf32> -> vector<8x8x8xf32>
    "tpu.trace_stop"() : () -> ()
    %c0_25 = arith.constant 0 : index
    %c0_26 = arith.constant 0 : index
    %c0_27 = arith.constant 0 : index
    %44 = vector.load %arg9[%c0_25, %c0_26, %c0_27] : memref<4x1x8xf32, #tpu.memory_space<vmem>>, vector<4x1x8xf32>
    %45 = vector.shape_cast %44 : vector<4x1x8xf32> to vector<4x1x1x8xf32>
    %46 = vector.shape_cast %45 : vector<4x1x1x8xf32> to vector<4x1x1x8xf32>
    %47 = vector.broadcast %46 : vector<4x1x1x8xf32> to vector<4x2x1x8xf32>
    %48 = vector.shape_cast %47 : vector<4x2x1x8xf32> to vector<8x1x8xf32>
    %49 = vector.broadcast %48 : vector<8x1x8xf32> to vector<8x8x8xf32>
    %50 = arith.addf %43, %49 : vector<8x8x8xf32>
    %51 = arith.truncf %18 : vector<8x8x8xf32> to vector<8x8x8xbf16>
    %52 = arith.truncf %34 : vector<8x8x8xf32> to vector<8x8x8xbf16>
    %53 = arith.truncf %50 : vector<8x8x8xf32> to vector<8x8x8xbf16>
    "tpu.trace_start"() <{level = 10 : i32, message = "gqd,gkd->gqk"}> : () -> ()
    %cst_28 = arith.constant dense<0.000000e+00> : vector<8x8x8xf32>
    %54 = tpu.matmul %51, %52, %cst_28 {dimension_numbers = #tpu.dot_dimension_numbers<[2], [2], [1], [1], [0, 0, 0, 1, 1, 1], [0], [0]>} : vector<8x8x8xbf16>, vector<8x8x8xbf16>, vector<8x8x8xf32> -> vector<8x8x8xf32>
    "tpu.trace_stop"() : () -> ()
    %cst_29 = arith.constant dense<0xFF800000> : vector<8x8xf32>
    %55 = vector.multi_reduction <maximumf>, %54, %cst_29 [2] : vector<8x8x8xf32> to vector<8x8xf32>
    %56 = vector.shape_cast %55 : vector<8x8xf32> to vector<8x8x1xf32>
    %57 = vector.broadcast %56 : vector<8x8x1xf32> to vector<8x8x8xf32>
    %58 = arith.subf %54, %57 : vector<8x8x8xf32>
    %59 = math.exp %58 : vector<8x8x8xf32>
    %cst_30 = arith.constant dense<0.000000e+00> : vector<8x8xf32>
    %60 = vector.multi_reduction <add>, %59, %cst_30 [2] : vector<8x8x8xf32> to vector<8x8xf32>
    %61 = vector.shape_cast %60 : vector<8x8xf32> to vector<8x8x1xf32>
    %62 = tpu.reciprocal %61 {approx = true} : vector<8x8x1xf32> -> vector<8x8x1xf32>
    %63 = vector.broadcast %62 : vector<8x8x1xf32> to vector<8x8x8xf32>
    %64 = arith.mulf %59, %63 : vector<8x8x8xf32>
    %65 = arith.truncf %64 : vector<8x8x8xf32> to vector<8x8x8xbf16>
    "tpu.trace_start"() <{level = 10 : i32, message = "gqk,gkd->gqd"}> : () -> ()
    %cst_31 = arith.constant dense<0.000000e+00> : vector<8x8x8xf32>
    %66 = tpu.matmul %65, %53, %cst_31 {dimension_numbers = #tpu.dot_dimension_numbers<[2], [1], [1], [2], [0, 0, 0, 1, 1, 2], [0], [0]>} : vector<8x8x8xbf16>, vector<8x8x8xbf16>, vector<8x8x8xf32> -> vector<8x8x8xf32>
    "tpu.trace_stop"() : () -> ()
    %67 = arith.truncf %66 : vector<8x8x8xf32> to vector<8x8x8xbf16>
    %c0_32 = arith.constant 0 : index
    %c0_33 = arith.constant 0 : index
    %c0_34 = arith.constant 0 : index
    %68 = vector.load %arg10[%c0_32, %c0_33, %c0_34] : memref<4x8x32xbf16, #tpu.memory_space<vmem>>, vector<4x8x32xbf16>
    %69 = vector.shape_cast %68 : vector<4x8x32xbf16> to vector<4x1x8x32xbf16>
    %70 = vector.shape_cast %69 : vector<4x1x8x32xbf16> to vector<4x1x8x32xbf16>
    %71 = vector.broadcast %70 : vector<4x1x8x32xbf16> to vector<4x2x8x32xbf16>
    %72 = vector.shape_cast %71 : vector<4x2x8x32xbf16> to vector<8x8x32xbf16>
    "tpu.trace_start"() <{level = 10 : i32, message = "gsd,gde->gse"}> : () -> ()
    %cst_35 = arith.constant dense<0.000000e+00> : vector<8x8x32xf32>
    %73 = tpu.matmul %67, %72, %cst_35 {dimension_numbers = #tpu.dot_dimension_numbers<[2], [1], [1], [2], [0, 0, 0, 1, 1, 2], [0], [0]>} : vector<8x8x8xbf16>, vector<8x8x32xbf16>, vector<8x8x32xf32> -> vector<8x8x32xf32>
    "tpu.trace_stop"() : () -> ()
    %74 = vector.shape_cast %73 : vector<8x8x32xf32> to vector<4x2x8x32xf32>
    %cst_36 = arith.constant dense<0.000000e+00> : vector<2x8x32xf32>
    %75 = vector.multi_reduction <add>, %74, %cst_36 [0] : vector<4x2x8x32xf32> to vector<2x8x32xf32>
    %c0_37 = arith.constant 0 : index
    %c0_38 = arith.constant 0 : index
    %76 = vector.load %arg11[%c0_37, %c0_38] : memref<1x32xf32, #tpu.memory_space<vmem>>, vector<1x32xf32>
    %77 = vector.shape_cast %76 : vector<1x32xf32> to vector<1x1x32xf32>
    %78 = vector.broadcast %77 : vector<1x1x32xf32> to vector<2x8x32xf32>
    %79 = arith.addf %75, %78 : vector<2x8x32xf32>
    %c0_39 = arith.constant 0 : index
    %c0_40 = arith.constant 0 : index
    %c0_41 = arith.constant 0 : index
    %80 = vector.load %arg12[%c0_39, %c0_40, %c0_41] : memref<2x8x32xf32, #tpu.memory_space<vmem>>, vector<2x8x32xf32>
    tpu.vector_store %arg12[%c0_39, %c0_40, %c0_41], %79 {strides = array<i32>} : memref<2x8x32xf32, #tpu.memory_space<vmem>>, vector<2x8x32xf32>,
    return
  }
  func.func @transform_0(%arg0: i32) -> (i32, i32, i32) {
    %c0_i32 = arith.constant 0 : i32
    %c0_i32_0 = arith.constant 0 : i32
    %c0_i32_1 = arith.constant 0 : i32
    return %arg0, %c0_i32, %c0_i32_0 : i32, i32, i32
  }
  func.func @transform_1(%arg0: i32) -> (i32, i32, i32) {
    %c0_i32 = arith.constant 0 : i32
    %c0_i32_0 = arith.constant 0 : i32
    %c0_i32_1 = arith.constant 0 : i32
    return %arg0, %c0_i32, %c0_i32_0 : i32, i32, i32
  }
  func.func @transform_2(%arg0: i32) -> (i32, i32, i32) {
    %c0_i32 = arith.constant 0 : i32
    %c0_i32_0 = arith.constant 0 : i32
    %c0_i32_1 = arith.constant 0 : i32
    return %arg0, %c0_i32, %c0_i32_0 : i32, i32, i32
  }
  func.func @transform_3(%arg0: i32) -> (i32, i32, i32) {
    %c0_i32 = arith.constant 0 : i32
    %c0_i32_0 = arith.constant 0 : i32
    %c0_i32_1 = arith.constant 0 : i32
    %c0_i32_2 = arith.constant 0 : i32
    return %c0_i32, %c0_i32_0, %c0_i32_1 : i32, i32, i32
  }
  func.func @transform_4(%arg0: i32) -> (i32, i32, i32) {
    %c0_i32 = arith.constant 0 : i32
    %c0_i32_0 = arith.constant 0 : i32
    %c0_i32_1 = arith.constant 0 : i32
    %c0_i32_2 = arith.constant 0 : i32
    return %c0_i32, %c0_i32_0, %c0_i32_1 : i32, i32, i32
  }
  func.func @transform_5(%arg0: i32) -> (i32, i32, i32) {
    %c0_i32 = arith.constant 0 : i32
    %c0_i32_0 = arith.constant 0 : i32
    %c0_i32_1 = arith.constant 0 : i32
    %c0_i32_2 = arith.constant 0 : i32
    return %c0_i32, %c0_i32_0, %c0_i32_1 : i32, i32, i32
  }
  func.func @transform_6(%arg0: i32) -> (i32, i32, i32) {
    %c0_i32 = arith.constant 0 : i32
    %c0_i32_0 = arith.constant 0 : i32
    %c0_i32_1 = arith.constant 0 : i32
    %c0_i32_2 = arith.constant 0 : i32
    return %c0_i32, %c0_i32_0, %c0_i32_1 : i32, i32, i32
  }
  func.func @transform_7(%arg0: i32) -> (i32, i32, i32) {
    %c0_i32 = arith.constant 0 : i32
    %c0_i32_0 = arith.constant 0 : i32
    %c0_i32_1 = arith.constant 0 : i32
    %c0_i32_2 = arith.constant 0 : i32
    return %c0_i32, %c0_i32_0, %c0_i32_1 : i32, i32, i32
  }
  func.func @transform_8(%arg0: i32) -> (i32, i32, i32) {
    %c0_i32 = arith.constant 0 : i32
    %c0_i32_0 = arith.constant 0 : i32
    %c0_i32_1 = arith.constant 0 : i32
    %c0_i32_2 = arith.constant 0 : i32
    return %c0_i32, %c0_i32_0, %c0_i32_1 : i32, i32, i32
  }
  func.func @transform_9(%arg0: i32) -> (i32, i32, i32) {
    %c0_i32 = arith.constant 0 : i32
    %c0_i32_0 = arith.constant 0 : i32
    %c0_i32_1 = arith.constant 0 : i32
    %c0_i32_2 = arith.constant 0 : i32
    return %c0_i32, %c0_i32_0, %c0_i32_1 : i32, i32, i32
  }
  func.func @transform_10(%arg0: i32) -> (i32, i32) {
    %c0_i32 = arith.constant 0 : i32
    %c0_i32_0 = arith.constant 0 : i32
    %c0_i32_1 = arith.constant 0 : i32
    return %c0_i32, %c0_i32_0 : i32, i32
  }
  func.func @transform_11(%arg0: i32) -> (i32, i32, i32) {
    %c0_i32 = arith.constant 0 : i32
    %c0_i32_0 = arith.constant 0 : i32
    %c0_i32_1 = arith.constant 0 : i32
    return %arg0, %c0_i32, %c0_i32_0 : i32, i32, i32
  }
}

</mosaic_0001>

<bundles_post_ra>
// kernel: tpu_custom_call.1
= control target key start
LH: loop header
LB: loop body
LE: loop exit
PB: predicated region body
PF: predicated region fallthrough
CT: control target
= control target key end

     0   :  { %v3194_v1 = vmov 0.0   ;;  %vm3195_vm0 = vmmov 0   ;;  %vm102_vm1 = vcmask 261120   ;;  %s3730_s0 = inlined_call_operand.vmem [shape: bf16[2,8,32], index: 0, kind: input, shape index: {}]   ;;  %s3731_s1 = inlined_call_operand.vmem [shape: bf16[2,8,32], index: 1, kind: input, shape index: {}]   ;;  %s3732_s2 = inlined_call_operand.vmem [shape: bf16[2,8,32], index: 2, kind: input, shape index: {}]   ;;  %s3733_s3 = inlined_call_operand.vmem [shape: bf16[4,32,8], index: 3, kind: input, shape index: {}]   ;;  %s3734_s4 = inlined_call_operand.vmem [shape: f32[4,1,8], index: 4, kind: input, shape index: {}]   ;;  %s3735_s5 = inlined_call_operand.vmem [shape: bf16[4,32,8], index: 5, kind: input, shape index: {}]   ;;  %s3736_s6 = inlined_call_operand.vmem [shape: f32[4,1,8], index: 6, kind: input, shape index: {}]   ;;  %s3737_s7 = inlined_call_operand.vmem [shape: bf16[4,32,8], index: 7, kind: input, shape index: {}]   ;;  %s3738_s8 = inlined_call_operand.vmem [shape: f32[4,1,8], index: 8, kind: input, shape index: {}]   ;;  %s3739_s9 = inlined_call_operand.vmem [shape: bf16[4,8,32], index: 9, kind: input, shape index: {}]   ;;  %s3740_s10 = inlined_call_operand.vmem [shape: f32[1,32], index: 10, kind: input, shape index: {}]   ;;  %s3741_s11 = inlined_call_operand.hbm [shape: f32[2,8,32], index: 11, kind: output, shape index: {}]  }
   0x1   :  { %v3114_v0 = vld [vmem:[%s3733_s3] sm:$0xff]   ;;  %2773 = vmatprep.subr.bf16.mxu0 %v3194_v1  ;;  %2781 = vmatprep.subr.bf16.mxu1 %v3194_v1  ;;  %v3115_v2 = vld [vmem:[%s3733_s3 + $0x8] sm:$0xff]   ;;  %v3116_v5 = vld [vmem:[%s3733_s3 + $0x10] sm:$0xff]  }
   0x2   :  { %2774 = vmatpush3.bf16.msra.mxu0 %v3114_v0  ;;  %2782 = vmatpush3.bf16.msra.mxu1 %v3114_v0  ;;  %v40_v3 = vld [vmem:[%s3730_s0] sm:$0xf]  ;;  %v41_v4 = vld [vmem:[%s3730_s0 + $0x4] sm:$0xf]  ;;  %v3117_v6 = vld [vmem:[%s3733_s3 + $0x18] sm:$0xff]  }
   0x3   :  { %2775 = vmatprep.subr.bf16.mxu0 %v3194_v1  ;;  %2783 = vmatprep.subr.bf16.mxu1 %v3194_v1  ;;  %v3118_v7 = vld [vmem:[%s3733_s3 + $0x20] sm:$0xff]   ;;  %v3119_v8 = vld [vmem:[%s3733_s3 + $0x28] sm:$0xff]   ;;  %v3120_v9 = vld [vmem:[%s3733_s3 + $0x30] sm:$0xff]  }
   0x4   :  { %2777 = vmatprep.mubr.msk.bf16.mxu0 %vm3195_vm0, %v3194_v1  ;;  %2785 = vmatprep.mubr.msk.bf16.mxu1 %vm3195_vm0, %v3194_v1 }
   0x6   :  { %2776 = vmatpush3.bf16.msra.mxu0 %v3115_v2  ;;  %2784 = vmatpush3.bf16.msra.mxu1 %v3115_v2 }
   0x7   :  { %2789 = vmatprep.subr.bf16.mxu0 %v3194_v1  ;;  %2797 = vmatprep.subr.bf16.mxu1 %v3194_v1 }
   0x9   :  { %2778 = vmatmul.mubr.msk.bf16.vlgmr.msra.gmra.mrb[0].mxu0 %vm102_vm1, %v40_v3  ;;  %2786 = vmatmul.mubr.msk.bf16.vlgmr.msra.gmra.mrb[0].mxu1 %vm102_vm1, %v41_v4 }
   0xa   :  { %2790 = vmatpush3.bf16.msra.mxu0 %v3116_v5  ;;  %2798 = vmatpush3.bf16.msra.mxu1 %v3116_v5 }
   0xb   :  { %2791 = vmatprep.subr.bf16.mxu0 %v3194_v1  ;;  %2799 = vmatprep.subr.bf16.mxu1 %v3194_v1 }
   0xc   :  { %2793 = vmatprep.mubr.msk.bf16.mxu0 %vm3195_vm0, %v3194_v1  ;;  %2801 = vmatprep.mubr.msk.bf16.mxu1 %vm3195_vm0, %v3194_v1 }
   0xe   :  { %2792 = vmatpush3.bf16.msra.mxu0 %v3117_v6  ;;  %2800 = vmatpush3.bf16.msra.mxu1 %v3117_v6 }
   0xf   :  { %2805 = vmatprep.subr.bf16.mxu0 %v3194_v1  ;;  %2813 = vmatprep.subr.bf16.mxu1 %v3194_v1 }
  0x11   :  { %2794 = vmatmul.mubr.msk.bf16.vlgmr.msra.gmra.mrb[4].mxu0 %vm102_vm1, %v40_v3  ;;  %2802 = vmatmul.mubr.msk.bf16.vlgmr.msra.gmra.mrb[4].mxu1 %vm102_vm1, %v41_v4 }
  0x12   :  { %2806 = vmatpush3.bf16.msra.mxu0 %v3118_v7  ;;  %2814 = vmatpush3.bf16.msra.mxu1 %v3118_v7 }
  0x13   :  { %2807 = vmatprep.subr.bf16.mxu0 %v3194_v1  ;;  %2815 = vmatprep.subr.bf16.mxu1 %v3194_v1 }
  0x14   :  { %2809 = vmatprep.mubr.msk.bf16.mxu0 %vm3195_vm0, %v3194_v1  ;;  %2817 = vmatprep.mubr.msk.bf16.mxu1 %vm3195_vm0, %v3194_v1 }
  0x16   :  { %2808 = vmatpush3.bf16.msra.mxu0 %v3119_v8  ;;  %2816 = vmatpush3.bf16.msra.mxu1 %v3119_v8 }
  0x17   :  { %2821 = vmatprep.subr.bf16.mxu0 %v3194_v1  ;;  %2829 = vmatprep.subr.bf16.mxu1 %v3194_v1 }
  0x18   :  { %16 = vsyncpa [#allocation3], 0  ;;  %v3121_v10 = vld [vmem:[%s3733_s3 + $0x38] sm:$0xff]   ;;  %v3122_v11 = vld [vmem:[%s3735_s5] sm:$0xff]   ;;  %vm1325_vm2 = vcmask 64512   ;;  %vm1793_vm3 = vcmask 1043456  }
  0x19   :  { %2810 = vmatmul.mubr.msk.bf16.vlgmr.msra.gmra.mrb[8].mxu0 %vm102_vm1, %v40_v3  ;;  %2818 = vmatmul.mubr.msk.bf16.vlgmr.msra.gmra.mrb[8].mxu1 %vm102_vm1, %v41_v4  ;;  %v3123_v12 = vld [vmem:[%s3735_s5 + $0x8] sm:$0xff]   ;;  %v42_v13 = vld [vmem:[%s3731_s1] sm:$0xf]  ;;  %v43_v14 = vld [vmem:[%s3731_s1 + $0x4] sm:$0xf]  ;;  %s3196_s15 = smov [#allocation2]  }
  0x1a   :  { %2822 = vmatpush3.bf16.msra.mxu0 %v3120_v9  ;;  %2830 = vmatpush3.bf16.msra.mxu1 %v3120_v9  ;;  %v3124_v15 = vld [vmem:[%s3735_s5 + $0x10] sm:$0xff]   ;;  %v3125_v16 = vld [vmem:[%s3735_s5 + $0x18] sm:$0xff]   ;;  %v3126_v17 = vld [vmem:[%s3735_s5 + $0x20] sm:$0xff]   ;;  %s2557_s16 = sshll.u32 %s3196_s15, 4  ;;  %s2558_s16 = int_to_ptr.vmem [resolvable:$true] %s2557_s16 }
  0x1b   :  { %2823 = vmatprep.subr.bf16.mxu0 %v3194_v1  ;;  %2831 = vmatprep.subr.bf16.mxu1 %v3194_v1  ;;  %v3127_v18 = vld [vmem:[%s3735_s5 + $0x28] sm:$0xff]   ;;  %v3128_v19 = vld [vmem:[%s3735_s5 + $0x30] sm:$0xff]   ;;  %v3129_v20 = vld [vmem:[%s3735_s5 + $0x38] sm:$0xff]   ;;  %p3175_p1 = scmp.lt.s32.totalorder %s2558_s16, %s2558_s16 }
  0x1c   :  { %2825 = vmatprep.mubr.msk.bf16.mxu0 %vm3195_vm0, %v3194_v1  ;;  %2833 = vmatprep.mubr.msk.bf16.mxu1 %vm3195_vm0, %v3194_v1  ;;  %v3130_v21 = vld [vmem:[%s3737_s7] sm:$0xff]   ;;  %v3131_v22 = vld [vmem:[%s3737_s7 + $0x8] sm:$0xff]   ;;  %v3132_v24 = vld [vmem:[%s3737_s7 + $0x10] sm:$0xff]  }
  0x1d   :  { %v44_v23 = vld [vmem:[%s3732_s2] sm:$0xf]  ;;  %v45_v25 = vld [vmem:[%s3732_s2 + $0x4] sm:$0xf]  ;;  %v3133_v26 = vld [vmem:[%s3737_s7 + $0x18] sm:$0xff]  }
  0x1e   :  { %2824 = vmatpush3.bf16.msra.mxu0 %v3121_v10  ;;  %2832 = vmatpush3.bf16.msra.mxu1 %v3121_v10  ;;  %v3134_v27 = vld [vmem:[%s3737_s7 + $0x20] sm:$0xff]   ;;  %v3135_v28 = vld [vmem:[%s3737_s7 + $0x28] sm:$0xff]   ;;  %v3136_v29 = vld [vmem:[%s3737_s7 + $0x30] sm:$0xff]  }
  0x1f   :  { %2837 = vmatprep.subr.bf16.mxu0 %v3194_v1  ;;  %2845 = vmatprep.subr.bf16.mxu1 %v3194_v1  ;;  %v3137_v30 = vld [vmem:[%s3737_s7 + $0x38] sm:$0xff]   ;;  %v2588_v63 = vld [vmem:[%s3736_s6] ss:$0 sm:$0xff] }
  0x21   :  { %2826 = vmatmul.mubr.msk.bf16.vlgmr.msra.gmra.mrb[12].mxu0 %vm102_vm1, %v40_v3  ;;  %2834 = vmatmul.mubr.msk.bf16.vlgmr.msra.gmra.mrb[12].mxu1 %vm102_vm1, %v41_v4 }
  0x22   :  { %2838 = vmatpush3.bf16.msra.mxu0 %v3122_v11  ;;  %2846 = vmatpush3.bf16.msra.mxu1 %v3122_v11 }
  0x23   :  { %2839 = vmatprep.subr.bf16.mxu0 %v3194_v1  ;;  %2847 = vmatprep.subr.bf16.mxu1 %v3194_v1 }
  0x24   :  { %2841 = vmatprep.mubr.msk.bf16.mxu0 %vm3195_vm0, %v3194_v1  ;;  %2849 = vmatprep.mubr.msk.bf16.mxu1 %vm3195_vm0, %v3194_v1 }
  0x26   :  { %2840 = vmatpush3.bf16.msra.mxu0 %v3123_v12  ;;  %2848 = vmatpush3.bf16.msra.mxu1 %v3123_v12 }
  0x27   :  { %2853 = vmatprep.subr.bf16.mxu0 %v3194_v1  ;;  %2861 = vmatprep.subr.bf16.mxu1 %v3194_v1 }
  0x29   :  { %2842 = vmatmul.mubr.msk.bf16.vlgmr.msra.gmra.mrb[16].mxu0 %vm102_vm1, %v42_v13  ;;  %2850 = vmatmul.mubr.msk.bf16.vlgmr.msra.gmra.mrb[16].mxu1 %vm102_vm1, %v43_v14 }
  0x2a   :  { %2854 = vmatpush3.bf16.msra.mxu0 %v3124_v15  ;;  %2862 = vmatpush3.bf16.msra.mxu1 %v3124_v15 }
  0x2b   :  { %2855 = vmatprep.subr.bf16.mxu0 %v3194_v1  ;;  %2863 = vmatprep.subr.bf16.mxu1 %v3194_v1 }
  0x2c   :  { %2857 = vmatprep.mubr.msk.bf16.mxu0 %vm3195_vm0, %v3194_v1  ;;  %2865 = vmatprep.mubr.msk.bf16.mxu1 %vm3195_vm0, %v3194_v1 }
  0x2e   :  { %2856 = vmatpush3.bf16.msra.mxu0 %v3125_v16  ;;  %2864 = vmatpush3.bf16.msra.mxu1 %v3125_v16  ;;  %v2589_v16 = vld [vmem:[%s3736_s6 + $0x1] ss:$0 sm:$0xff] }
  0x2f   :  { %2869 = vmatprep.subr.bf16.mxu0 %v3194_v1  ;;  %2877 = vmatprep.subr.bf16.mxu1 %v3194_v1 }
  0x31   :  { %2858 = vmatmul.mubr.msk.bf16.vlgmr.msra.gmra.mrb[20].mxu0 %vm102_vm1, %v42_v13  ;;  %2866 = vmatmul.mubr.msk.bf16.vlgmr.msra.gmra.mrb[20].mxu1 %vm102_vm1, %v43_v14 }
  0x32   :  { %2870 = vmatpush3.bf16.msra.mxu0 %v3126_v17  ;;  %2878 = vmatpush3.bf16.msra.mxu1 %v3126_v17 }
  0x33   :  { %2871 = vmatprep.subr.bf16.mxu0 %v3194_v1  ;;  %2879 = vmatprep.subr.bf16.mxu1 %v3194_v1 }
  0x34   :  { %2873 = vmatprep.mubr.msk.bf16.mxu0 %vm3195_vm0, %v3194_v1  ;;  %2881 = vmatprep.mubr.msk.bf16.mxu1 %vm3195_vm0, %v3194_v1 }
  0x36   :  { %2872 = vmatpush3.bf16.msra.mxu0 %v3127_v18  ;;  %2880 = vmatpush3.bf16.msra.mxu1 %v3127_v18 }
  0x37   :  { %2885 = vmatprep.subr.bf16.mxu0 %v3194_v1  ;;  %2893 = vmatprep.subr.bf16.mxu1 %v3194_v1 }
  0x39   :  { %2874 = vmatmul.mubr.msk.bf16.vlgmr.msra.gmra.mrb[24].mxu0 %vm102_vm1, %v42_v13  ;;  %2882 = vmatmul.mubr.msk.bf16.vlgmr.msra.gmra.mrb[24].mxu1 %vm102_vm1, %v43_v14 }
  0x3a   :  { %2886 = vmatpush3.bf16.msra.mxu0 %v3128_v19  ;;  %2894 = vmatpush3.bf16.msra.mxu1 %v3128_v19 }
  0x3b   :  { %2887 = vmatprep.subr.bf16.mxu0 %v3194_v1  ;;  %2895 = vmatprep.subr.bf16.mxu1 %v3194_v1 }
  0x3c   :  { %2889 = vmatprep.mubr.msk.bf16.mxu0 %vm3195_vm0, %v3194_v1  ;;  %2897 = vmatprep.mubr.msk.bf16.mxu1 %vm3195_vm0, %v3194_v1 }
  0x3e   :  { %2888 = vmatpush3.bf16.msra.mxu0 %v3129_v20  ;;  %2896 = vmatpush3.bf16.msra.mxu1 %v3129_v20 }
  0x3f   :  { %2901 = vmatprep.subr.bf16.mxu0 %v3194_v1  ;;  %2909 = vmatprep.subr.bf16.mxu1 %v3194_v1 }
  0x41   :  { %2890 = vmatmul.mubr.msk.bf16.vlgmr.msra.gmra.mrb[28].mxu0 %vm102_vm1, %v42_v13  ;;  %2898 = vmatmul.mubr.msk.bf16.vlgmr.msra.gmra.mrb[28].mxu1 %vm102_vm1, %v43_v14  ;;  %v2568_v13 = vld [vmem:[%s3734_s4] ss:$0 sm:$0xff] }
  0x42   :  { %2902 = vmatpush3.bf16.msra.mxu0 %v3130_v21  ;;  %2910 = vmatpush3.bf16.msra.mxu1 %v3130_v21 }
  0x43   :  { %2903 = vmatprep.subr.bf16.mxu0 %v3194_v1  ;;  %2911 = vmatprep.subr.bf16.mxu1 %v3194_v1 }
  0x44   :  { %2905 = vmatprep.mubr.msk.bf16.mxu0 %vm3195_vm0, %v3194_v1  ;;  %2913 = vmatprep.mubr.msk.bf16.mxu1 %vm3195_vm0, %v3194_v1 }
  0x46   :  { %2904 = vmatpush3.bf16.msra.mxu0 %v3131_v22  ;;  %2912 = vmatpush3.bf16.msra.mxu1 %v3131_v22 }
  0x47   :  { %2917 = vmatprep.subr.bf16.mxu0 %v3194_v1  ;;  %2925 = vmatprep.subr.bf16.mxu1 %v3194_v1 }
  0x49   :  { %2906 = vmatmul.mubr.msk.bf16.vlgmr.msra.gmra.mrb[32].mxu0 %vm102_vm1, %v44_v23  ;;  %2914 = vmatmul.mubr.msk.bf16.vlgmr.msra.gmra.mrb[32].mxu1 %vm102_vm1, %v45_v25 }
  0x4a   :  { %2918 = vmatpush3.bf16.msra.mxu0 %v3132_v24  ;;  %2921 = vmatprep.mubr.msk.bf16.mxu0 %vm3195_vm0, %v3194_v1 }
  0x4b   :  { %2919 = vmatprep.subr.bf16.mxu0 %v3194_v1  ;;  %2926 = vmatpush3.bf16.msra.mxu1 %v3132_v24 }
  0x4c   :  { %2929 = vmatprep.mubr.msk.bf16.mxu1 %vm3195_vm0, %v3194_v1  ;;  %2927 = vmatprep.subr.bf16.mxu1 %v3194_v1 }
  0x4e   :  { %2920 = vmatpush3.bf16.msra.mxu0 %v3133_v26 }
  0x4f   :  { %2933 = vmatprep.subr.bf16.mxu0 %v3194_v1  ;;  %2928 = vmatpush3.bf16.msra.mxu1 %v3133_v26 }
  0x50   :  { %2941 = vmatprep.subr.bf16.mxu1 %v3194_v1 }
  0x51   :  { %2922 = vmatmul.mubr.msk.bf16.vlgmr.msra.gmra.mrb[36].mxu0 %vm102_vm1, %v44_v23 }
  0x52   :  { %2934 = vmatpush3.bf16.msra.mxu0 %v3134_v27  ;;  %2937 = vmatprep.mubr.msk.bf16.mxu0 %vm3195_vm0, %v3194_v1 }
  0x53   :  { %2935 = vmatprep.subr.bf16.mxu0 %v3194_v1  ;;  %2930 = vmatmul.mubr.msk.bf16.vlgmr.msra.gmra.mrb[36].mxu1 %vm102_vm1, %v45_v25 }
  0x54   :  { %2942 = vmatpush3.bf16.msra.mxu1 %v3134_v27  ;;  %2945 = vmatprep.mubr.msk.bf16.mxu1 %vm3195_vm0, %v3194_v1 }
  0x55   :  { %2943 = vmatprep.subr.bf16.mxu1 %v3194_v1 }
  0x56   :  { %2936 = vmatpush3.bf16.msra.mxu0 %v3135_v28 }
  0x57   :  { %2949 = vmatprep.subr.bf16.mxu0 %v3194_v1 }
  0x58   :  { %2944 = vmatpush3.bf16.msra.mxu1 %v3135_v28 }
  0x59   :  { %2938 = vmatmul.mubr.msk.bf16.vlgmr.msra.gmra.mrb[40].mxu0 %vm102_vm1, %v44_v23  ;;  %2957 = vmatprep.subr.bf16.mxu1 %v3194_v1 }
  0x5a   :  { %2953 = vmatprep.mubr.msk.bf16.mxu0 %vm3195_vm0, %v3194_v1  ;;  %2950 = vmatpush3.bf16.msra.mxu0 %v3136_v29 }
  0x5b   :  { %2946 = vmatmul.mubr.msk.bf16.vlgmr.msra.gmra.mrb[40].mxu1 %vm102_vm1, %v45_v25  ;;  %2951 = vmatprep.subr.bf16.mxu0 %v3194_v1 }
  0x5c   :  { %2958 = vmatpush3.bf16.msra.mxu1 %v3136_v29  ;;  %2961 = vmatprep.mubr.msk.bf16.mxu1 %vm3195_vm0, %v3194_v1 }
  0x5d   :  { %2959 = vmatprep.subr.bf16.mxu1 %v3194_v1 }
  0x5e   :  { %2952 = vmatpush3.bf16.msra.mxu0 %v3137_v30 }
  0x5f   :  { %2965 = vmatprep.subr.bf16.mxu0 %v3194_v1 }
  0x60   :  { %2960 = vmatpush3.bf16.msra.mxu1 %v3137_v30 }
  0x61   :  { %2971 = vmatprep.subr.bf16.mxu1 %v3194_v1  ;;  %2954 = vmatmul.mubr.msk.bf16.vlgmr.msra.gmra.mrb[44].mxu0 %vm102_vm1, %v44_v23 }
  0x62   :  { %2967 = vmatprep.mubr.msk.bf16.mxu0 %vm3195_vm0, %v3194_v1 }
  0x63   :  { %2962 = vmatmul.mubr.msk.bf16.vlgmr.msra.gmra.mrb[44].mxu1 %vm102_vm1, %v45_v25 }
  0x64   :  { %2973 = vmatprep.mubr.msk.bf16.mxu1 %vm3195_vm0, %v3194_v1 }
  0xdc   :  { %v140_v31 = vpop.f32.mrb[0].mxu0  ;;  %v183_v32 = vpop.f32.mrb[0].mxu1 }
  0xdd   :  { %v2779_v33 = vpop.f32.mrb[1].mxu0  ;;  %v2787_v34 = vpop.f32.mrb[1].mxu1  ;;  %v141_v17 = vadd.f32 %v2568_v13, %v140_v31  ;;  %v184_v18 = vadd.f32 %v2568_v13, %v183_v32  ;;  %v2569_v31 = vld [vmem:[%s3734_s4 + $0x1] ss:$0 sm:$0xff] }
  0xde   :  { %v143_v35 = vpop.f32.mrb[2].mxu0  ;;  %v186_v36 = vpop.f32.mrb[2].mxu1 }
  0xdf   :  { %v2780_v37 = vpop.f32.mrb[3].mxu0  ;;  %v2788_v38 = vpop.f32.mrb[3].mxu1  ;;  %v1301_v27 = vpack.c.bf16 %v141_v17, %v141_v17  ;;  %v1302_v28 = vpack.c.bf16 %v184_v18, %v184_v18  ;;  %v2590_v36 = vld [vmem:[%s3736_s6 + $0x2] ss:$0 sm:$0xff] }
  0xe4   :  { %v3475_v39 = vpop.f32.mrb[4].mxu0  ;;  %v3477_v40 = vpop.f32.mrb[4].mxu1 }
  0xe5   :  { %v2795_v41 = vpop.f32.mrb[5].mxu0  ;;  %v2803_v42 = vpop.f32.mrb[5].mxu1  ;;  %v236_v37 = vadd.f32 %v2569_v31, %v3475_v39  ;;  %v276_v38 = vadd.f32 %v2569_v31, %v3477_v40 }
  0xe6   :  { %v238_v43 = vpop.f32.mrb[6].mxu0  ;;  %v278_v44 = vpop.f32.mrb[6].mxu1 }
  0xe7   :  { %v2796_v45 = vpop.f32.mrb[7].mxu0  ;;  %v2804_v46 = vpop.f32.mrb[7].mxu1  ;;  %v1304_v40 = vpack.c.bf16 %v276_v38, %v276_v38 }
  0xec   :  { %v3479_v47 = vpop.f32.mrb[8].mxu0  ;;  %v3481_v48 = vpop.f32.mrb[8].mxu1 }
  0xed   :  { %v2811_v49 = vpop.f32.mrb[9].mxu0  ;;  %v2819_v50 = vpop.f32.mrb[9].mxu1 }
  0xee   :  { %v330_v51 = vpop.f32.mrb[10].mxu0  ;;  %v370_v52 = vpop.f32.mrb[10].mxu1  ;;  %v1303_v50 = vpack.c.bf16 %v236_v37, %v236_v37 }
  0xef   :  { %v2812_v53 = vpop.f32.mrb[11].mxu0  ;;  %v2820_v54 = vpop.f32.mrb[11].mxu1 }
  0xf4   :  { %v3483_v55 = vpop.f32.mrb[12].mxu0  ;;  %v3485_v56 = vpop.f32.mrb[12].mxu1 }
  0xf5   :  { %v2827_v57 = vpop.f32.mrb[13].mxu0  ;;  %v2835_v58 = vpop.f32.mrb[13].mxu1 }
  0xf6   :  { %v422_v59 = vpop.f32.mrb[14].mxu0  ;;  %v462_v60 = vpop.f32.mrb[14].mxu1  ;;  %v2570_v57 = vld [vmem:[%s3734_s4 + $0x2] ss:$0 sm:$0xff] }
  0xf7   :  { %v2828_v61 = vpop.f32.mrb[15].mxu0  ;;  %v2836_v62 = vpop.f32.mrb[15].mxu1  ;;  %v2591_v60 = vld [vmem:[%s3736_s6 + $0x3] ss:$0 sm:$0xff] }
  0xf8   :  { %v328_v61 = vadd.f32 %v2570_v57, %v3479_v47  ;;  %v368_v62 = vadd.f32 %v2570_v57, %v3481_v48 }
  0xfa   :  { %v1306_v48 = vpack.c.bf16 %v368_v62, %v368_v62 }
  0xfc   :  { %v558_v0 = vpop.f32.mrb[16].mxu0  ;;  %v601_v2 = vpop.f32.mrb[16].mxu1 }
  0xfd   :  { %v559_v3 = vadd.f32 %v2588_v63, %v558_v0  ;;  %v602_v4 = vadd.f32 %v2588_v63, %v601_v2  ;;  %v2843_v5 = vpop.f32.mrb[17].mxu0  ;;  %v2851_v6 = vpop.f32.mrb[17].mxu1 }
  0xfe   :  { %v561_v7 = vpop.f32.mrb[18].mxu0  ;;  %v604_v8 = vpop.f32.mrb[18].mxu1 }
  0xff   :  { %v1309_v9 = vpack.c.bf16 %v559_v3, %v559_v3  ;;  %v1310_v10 = vpack.c.bf16 %v602_v4, %v602_v4  ;;  %v2844_v11 = vpop.f32.mrb[19].mxu0  ;;  %v2852_v12 = vpop.f32.mrb[19].mxu1  ;;  %v1305_v7 = vpack.c.bf16 %v328_v61, %v328_v61 }
 0x100   :  { %v2571_v12 = vld [vmem:[%s3734_s4 + $0x3] ss:$0 sm:$0xff] }
 0x101   :  { %v1330_v14 = vsel %vm1325_vm2, %v1309_v9, 0  ;;  %v1376_v15 = vsel %vm1325_vm2, %v1310_v10, 0 }
 0x102   :  { %2966 = vmatpush3.bf16.xpose.msra.mxu0 %v1330_v14  ;;  %2972 = vmatpush3.bf16.xpose.msra.mxu1 %v1376_v15  ;;  %v420_v15 = vadd.f32 %v2571_v12, %v3483_v55  ;;  %v2608_v55 = vld [vmem:[%s3738_s8] ss:$0 sm:$0xff] }
 0x103   :  { %2977 = vmatprep.subr.bf16.mxu0 %v3194_v1  ;;  %2983 = vmatprep.subr.bf16.mxu1 %v3194_v1 }
 0x104   :  { %v653_v19 = vpop.f32.mrb[20].mxu0  ;;  %v693_v20 = vpop.f32.mrb[20].mxu1  ;;  %v1307_v17 = vpack.c.bf16 %v420_v15, %v420_v15 }
 0x105   :  { %v654_v21 = vadd.f32 %v2589_v16, %v653_v19  ;;  %v694_v22 = vadd.f32 %v2589_v16, %v693_v20  ;;  %v2859_v23 = vpop.f32.mrb[21].mxu0  ;;  %v2867_v24 = vpop.f32.mrb[21].mxu1  ;;  %v460_v16 = vadd.f32 %v2571_v12, %v3485_v56 }
 0x106   :  { %v656_v25 = vpop.f32.mrb[22].mxu0  ;;  %v696_v26 = vpop.f32.mrb[22].mxu1 }
 0x107   :  { %v1311_v29 = vpack.c.bf16 %v654_v21, %v654_v21  ;;  %v1312_v30 = vpack.c.bf16 %v694_v22, %v694_v22  ;;  %v2860_v33 = vpop.f32.mrb[23].mxu0  ;;  %v2868_v34 = vpop.f32.mrb[23].mxu1  ;;  %v1308_v18 = vpack.c.bf16 %v460_v16, %v460_v16 }
 0x109   :  { %v1422_v32 = vsel %vm1325_vm2, %v1311_v29, 0  ;;  %v1468_v35 = vsel %vm1325_vm2, %v1312_v30, 0  ;;  %2968 = vmatmul.mubr.msk.bf16.vlgmr.msra.gmra.mrb[48].mxu0 %vm1325_vm2, %v1301_v27  ;;  %2974 = vmatmul.mubr.msk.bf16.vlgmr.msra.gmra.mrb[48].mxu1 %vm1325_vm2, %v1302_v28 }
 0x10a   :  { %2978 = vmatpush3.bf16.xpose.msra.mxu0 %v1422_v32  ;;  %2984 = vmatpush3.bf16.xpose.msra.mxu1 %v1468_v35 }
 0x10b   :  { %2979 = vmatprep.mubr.msk.bf16.mxu0 %vm3195_vm0, %v3194_v1  ;;  %2985 = vmatprep.mubr.msk.bf16.mxu1 %vm3195_vm0, %v3194_v1 }
 0x10c   :  { %v745_v41 = vpop.f32.mrb[24].mxu0  ;;  %v785_v42 = vpop.f32.mrb[24].mxu1  ;;  %2989 = vmatprep.subr.bf16.mxu0 %v3194_v1  ;;  %2995 = vmatprep.subr.bf16.mxu1 %v3194_v1 }
 0x10d   :  { %v746_v43 = vadd.f32 %v2590_v36, %v745_v41  ;;  %v786_v44 = vadd.f32 %v2590_v36, %v785_v42  ;;  %v2875_v45 = vpop.f32.mrb[25].mxu0  ;;  %v2883_v46 = vpop.f32.mrb[25].mxu1 }
 0x10e   :  { %v748_v49 = vpop.f32.mrb[26].mxu0  ;;  %v788_v39 = vpop.f32.mrb[26].mxu1 }
 0x10f   :  { %v1313_v51 = vpack.c.bf16 %v746_v43, %v746_v43  ;;  %v1314_v52 = vpack.c.bf16 %v786_v44, %v786_v44  ;;  %v2876_v53 = vpop.f32.mrb[27].mxu0  ;;  %v2884_v54 = vpop.f32.mrb[27].mxu1 }
 0x111   :  { %v1514_v58 = vsel %vm1325_vm2, %v1313_v51, 0  ;;  %v1560_v59 = vsel %vm1325_vm2, %v1314_v52, 0  ;;  %2980 = vmatmul.mubr.msk.bf16.vlgmr.msra.gmra.mrb[52].mxu0 %vm1325_vm2, %v1303_v50  ;;  %2986 = vmatmul.mubr.msk.bf16.vlgmr.msra.gmra.mrb[52].mxu1 %vm1325_vm2, %v1304_v40 }
 0x112   :  { %2990 = vmatpush3.bf16.xpose.msra.mxu0 %v1514_v58  ;;  %2996 = vmatpush3.bf16.xpose.msra.mxu1 %v1560_v59 }
 0x113   :  { %2991 = vmatprep.mubr.msk.bf16.mxu0 %vm3195_vm0, %v3194_v1  ;;  %2997 = vmatprep.mubr.msk.bf16.mxu1 %vm3195_vm0, %v3194_v1 }
 0x114   :  { %v837_v63 = vpop.f32.mrb[28].mxu0  ;;  %v877_v0 = vpop.f32.mrb[28].mxu1  ;;  %3001 = vmatprep.subr.bf16.mxu0 %v3194_v1  ;;  %3007 = vmatprep.subr.bf16.mxu1 %v3194_v1 }
 0x115   :  { %v838_v2 = vadd.f32 %v2591_v60, %v837_v63  ;;  %v878_v3 = vadd.f32 %v2591_v60, %v877_v0  ;;  %v2891_v4 = vpop.f32.mrb[29].mxu0  ;;  %v2899_v5 = vpop.f32.mrb[29].mxu1 }
 0x116   :  { %v840_v6 = vpop.f32.mrb[30].mxu0  ;;  %v880_v47 = vpop.f32.mrb[30].mxu1 }
 0x117   :  { %v1315_v8 = vpack.c.bf16 %v838_v2, %v838_v2  ;;  %v1316_v9 = vpack.c.bf16 %v878_v3, %v878_v3  ;;  %v2892_v10 = vpop.f32.mrb[31].mxu0  ;;  %v2900_v11 = vpop.f32.mrb[31].mxu1 }
 0x119   :  { %v1606_v13 = vsel %vm1325_vm2, %v1315_v8, 0  ;;  %v1652_v14 = vsel %vm1325_vm2, %v1316_v9, 0  ;;  %2992 = vmatmul.mubr.msk.bf16.vlgmr.msra.gmra.mrb[56].mxu0 %vm1325_vm2, %v1305_v7  ;;  %2998 = vmatmul.mubr.msk.bf16.vlgmr.msra.gmra.mrb[56].mxu1 %vm1325_vm2, %v1306_v48 }
 0x11a   :  { %3002 = vmatpush3.bf16.xpose.msra.mxu0 %v1606_v13  ;;  %3008 = vmatpush3.bf16.xpose.msra.mxu1 %v1652_v14 }
 0x11b   :  { %3003 = vmatprep.mubr.msk.bf16.mxu0 %vm3195_vm0, %v3194_v1  ;;  %3009 = vmatprep.mubr.msk.bf16.mxu1 %vm3195_vm0, %v3194_v1 }
 0x11c   :  { %3013 = vmatprep.subr.bf16.mxu0 %v3194_v1  ;;  %3019 = vmatprep.subr.bf16.mxu1 %v3194_v1  ;;  %v976_v56 = vpop.f32.mrb[32].mxu0  ;;  %v1019_v24 = vpop.f32.mrb[32].mxu1 }
 0x11d   :  { %v977_v19 = vadd.f32 %v2608_v55, %v976_v56  ;;  %v2907_v20 = vpop.f32.mrb[33].mxu0  ;;  %v1020_v25 = vadd.f32 %v2608_v55, %v1019_v24  ;;  %v2915_v26 = vpop.f32.mrb[33].mxu1 }
 0x11e   :  { %v979_v21 = vpop.f32.mrb[34].mxu0  ;;  %v1022_v28 = vpop.f32.mrb[34].mxu1 }
 0x11f   :  { %v1317_v22 = vpack.c.bf16 %v977_v19, %v977_v19  ;;  %v2908_v23 = vpop.f32.mrb[35].mxu0  ;;  %v1318_v29 = vpack.c.bf16 %v1020_v25, %v1020_v25  ;;  %v2916_v30 = vpop.f32.mrb[35].mxu1 }
 0x121   :  { %3004 = vmatmul.mubr.msk.bf16.vlgmr.msra.gmra.mrb[60].mxu0 %vm1325_vm2, %v1307_v17  ;;  %3010 = vmatmul.mubr.msk.bf16.vlgmr.msra.gmra.mrb[60].mxu1 %vm1325_vm2, %v1308_v18  ;;  %v1795_v27 = vsel %vm1793_vm3, %v1317_v22, 0  ;;  %v1841_v33 = vsel %vm1793_vm3, %v1318_v29, 0 }
 0x122   :  { %3015 = vmatprep.mubr.msk.bf16.mxu0 %vm3195_vm0, %v3194_v1  ;;  %3021 = vmatprep.mubr.msk.bf16.mxu1 %vm3195_vm0, %v3194_v1 }
 0x123   :  { %3014 = vmatpush3.bf16.msra.mxu0 %v1795_v27  ;;  %3020 = vmatpush3.bf16.msra.mxu1 %v1841_v33 }
 0x124   :  { %3025 = vmatprep.subr.bf16.mxu0 %v3194_v1  ;;  %v3563_v34 = vpop.f32.mrb[36].mxu0  ;;  %3031 = vmatprep.subr.bf16.mxu1 %v3194_v1 }
 0x125   :  { %v2923_v31 = vpop.f32.mrb[37].mxu0 }
 0x126   :  { %v1074_v32 = vpop.f32.mrb[38].mxu0  ;;  %v3566_v36 = vpop.f32.mrb[36].mxu1 }
 0x127   :  { %v2924_v35 = vpop.f32.mrb[39].mxu0  ;;  %v2931_v37 = vpop.f32.mrb[37].mxu1 }
 0x128   :  { %v1114_v38 = vpop.f32.mrb[38].mxu1 }
 0x129   :  { %v2932_v41 = vpop.f32.mrb[39].mxu1 }
 0x12c   :  { %v3568_v42 = vpop.f32.mrb[40].mxu0 }
 0x12d   :  { %v2939_v43 = vpop.f32.mrb[41].mxu0 }
 0x12e   :  { %v1166_v44 = vpop.f32.mrb[42].mxu0  ;;  %v3570_v46 = vpop.f32.mrb[40].mxu1 }
 0x12f   :  { %v2940_v45 = vpop.f32.mrb[43].mxu0  ;;  %v2947_v49 = vpop.f32.mrb[41].mxu1 }
 0x130   :  { %v1206_v39 = vpop.f32.mrb[42].mxu1 }
 0x131   :  { %v2948_v50 = vpop.f32.mrb[43].mxu1 }
 0x134   :  { %v3572_v40 = vpop.f32.mrb[44].mxu0 }
 0x135   :  { %v2955_v51 = vpop.f32.mrb[45].mxu0 }
 0x136   :  { %v3574_v52 = vpop.f32.mrb[44].mxu1  ;;  %v1258_v53 = vpop.f32.mrb[46].mxu0 }
 0x137   :  { %v2963_v54 = vpop.f32.mrb[45].mxu1  ;;  %v2956_v57 = vpop.f32.mrb[47].mxu0 }
 0x138   :  { %v1298_v58 = vpop.f32.mrb[46].mxu1 }
 0x139   :  { %v2964_v59 = vpop.f32.mrb[47].mxu1 }
 0x1dc   :  { %v1366_v60 = vpop.f32.mrb[48].mxu0  ;;  %v1412_v61 = vpop.f32.mrb[48].mxu1 }
 0x1dd   :  { %v2969_v62 = vpop.f32.mrb[49].mxu0  ;;  %v2975_v63 = vpop.f32.mrb[49].mxu1  ;;  %v1694_v0 = vsel %vm1325_vm2, %v1366_v60, -inf  ;;  %v1697_v6 = vsel %vm1325_vm2, %v1412_v61, -inf }
 0x1de   :  { %v1415_v2 = vpop.f32.mrb[50].mxu1  ;;  %1695 = vmax.xlane.f32.xlu0 %v1694_v0  ;;  %v1369_v3 = vpop.f32.mrb[50].mxu0 }
 0x1df   :  { %v2970_v4 = vpop.f32.mrb[51].mxu0  ;;  %v2976_v5 = vpop.f32.mrb[51].mxu1 }
 0x1e2   :  { %1698 = vmax.xlane.f32.xlu0 %v1697_v6 }
 0x1e4   :  { %v1458_v47 = vpop.f32.mrb[52].mxu0  ;;  %v1504_v7 = vpop.f32.mrb[52].mxu1 }
 0x1e5   :  { %v2981_v48 = vpop.f32.mrb[53].mxu0  ;;  %v2987_v8 = vpop.f32.mrb[53].mxu1  ;;  %v1700_v9 = vsel %vm1325_vm2, %v1458_v47, -inf  ;;  %v1703_v14 = vsel %vm1325_vm2, %v1504_v7, -inf }
 0x1e6   :  { %v1507_v10 = vpop.f32.mrb[54].mxu1  ;;  %1701 = vmax.xlane.f32.xlu1 %v1700_v9  ;;  %v1461_v11 = vpop.f32.mrb[54].mxu0 }
 0x1e7   :  { %v2982_v12 = vpop.f32.mrb[55].mxu0  ;;  %v2988_v13 = vpop.f32.mrb[55].mxu1 }
 0x1ea   :  { %1704 = vmax.xlane.f32.xlu1 %v1703_v14 }
 0x1ec   :  { %v1550_v15 = vpop.f32.mrb[56].mxu0  ;;  %v1596_v16 = vpop.f32.mrb[56].mxu1 }
 0x1ed   :  { %v2993_v17 = vpop.f32.mrb[57].mxu0  ;;  %v2999_v18 = vpop.f32.mrb[57].mxu1  ;;  %v1709_v55 = vsel %vm1325_vm2, %v1596_v16, -inf  ;;  %v1706_v56 = vsel %vm1325_vm2, %v1550_v15, -inf }
 0x1ee   :  { %v1599_v19 = vpop.f32.mrb[58].mxu1  ;;  %1710 = vmax.xlane.f32.xlu1 %v1709_v55  ;;  %1707 = vmax.xlane.f32.xlu0 %v1706_v56  ;;  %v1553_v20 = vpop.f32.mrb[58].mxu0  ;;  %v2609_v56 = vld [vmem:[%s3738_s8 + $0x1] ss:$0 sm:$0xff] }
 0x1ef   :  { %v2994_v21 = vpop.f32.mrb[59].mxu0  ;;  %v3000_v22 = vpop.f32.mrb[59].mxu1  ;;  %v1072_v19 = vadd.f32 %v2609_v56, %v3563_v34 }
 0x1f1   :  { %v1319_v22 = vpack.c.bf16 %v1072_v19, %v1072_v19  ;;  %v2169_v19 = vld [vmem:[%s3739_s9 + $0x8] sm:$0xf] }
 0x1f4   :  { %v1642_v23 = vpop.f32.mrb[60].mxu0  ;;  %v1688_v24 = vpop.f32.mrb[60].mxu1 }
 0x1f5   :  { %v3005_v25 = vpop.f32.mrb[61].mxu0  ;;  %v3011_v26 = vpop.f32.mrb[61].mxu1  ;;  %v1715_v27 = vsel %vm1325_vm2, %v1688_v24, -inf  ;;  %v1712_v28 = vsel %vm1325_vm2, %v1642_v23, -inf }
 0x1f6   :  { %v1691_v29 = vpop.f32.mrb[62].mxu1  ;;  %1716 = vmax.xlane.f32.xlu1 %v1715_v27  ;;  %1713 = vmax.xlane.f32.xlu0 %v1712_v28  ;;  %v1645_v30 = vpop.f32.mrb[62].mxu0  ;;  %v2610_v26 = vld [vmem:[%s3738_s8 + $0x2] ss:$0 sm:$0xff] }
 0x1f7   :  { %v3006_v33 = vpop.f32.mrb[63].mxu0  ;;  %v3012_v31 = vpop.f32.mrb[63].mxu1  ;;  %v1887_v29 = vsel %vm1793_vm3, %v1319_v22, 0  ;;  %v1164_v34 = vadd.f32 %v2610_v26, %v3568_v42  ;;  %v1204_v42 = vadd.f32 %v2610_v26, %v3570_v46 }
 0x26b   :  { %v1696_v32 = vpop.xlane.xlu0 %1695 }
 0x26c   :  { %v1718_v35 = vsub.f32 %v1366_v60, %v1696_v32 }
 0x26e   :  { %v1726_v37 = vmul.f32 1.442695, %v1718_v35 }
 0x26f   :  { %v1699_v38 = vpop.xlane.xlu0 %1698 }
 0x270   :  { %3138 = vpow2.f32 %v1726_v37  ;;  %v1719_v41 = vsub.f32 %v1412_v61, %v1699_v38  ;;  %v1321_v38 = vpack.c.bf16 %v1164_v34, %v1164_v34 }
 0x272   :  { %v1728_v43 = vmul.f32 1.442695, %v1719_v41 }
 0x273   :  { %v1702_v44 = vpop.xlane.xlu1 %1701 }
 0x274   :  { %3140 = vpow2.f32 %v1728_v43  ;;  %v1720_v45 = vsub.f32 %v1458_v47, %v1702_v44  ;;  %v2611_v43 = vld [vmem:[%s3738_s8 + $0x3] ss:$0 sm:$0xff] }
 0x276   :  { %v1730_v49 = vmul.f32 1.442695, %v1720_v45 }
 0x277   :  { %v1705_v39 = vpop.xlane.xlu1 %1704 }
 0x278   :  { %3142 = vpow2.f32 %v1730_v49  ;;  %v1721_v50 = vsub.f32 %v1504_v7, %v1705_v39  ;;  %v1979_v49 = vsel %vm1793_vm3, %v1321_v38, 0  ;;  %v1322_v39 = vpack.c.bf16 %v1204_v42, %v1204_v42 }
 0x27a   :  { %v3139_v51 = vpop.eup %3138  ;;  %v1732_v53 = vmul.f32 1.442695, %v1721_v50 }
 0x27b   :  { %v1711_v54 = vpop.xlane.xlu1 %1710  ;;  %v1708_v57 = vpop.xlane.xlu0 %1707  ;;  %v1742_v58 = vsel %vm1325_vm2, %v3139_v51, 0.0 }
 0x27c   :  { %3144 = vpow2.f32 %v1732_v53  ;;  %v1723_v59 = vsub.f32 %v1596_v16, %v1711_v54  ;;  %v1722_v60 = vsub.f32 %v1550_v15, %v1708_v57  ;;  %1743 = vadd.xlane.f32.xlu0 %v1742_v58 }
 0x27e   :  { %v3141_v62 = vpop.eup %3140  ;;  %v1736_v61 = vmul.f32 1.442695, %v1723_v59  ;;  %v1734_v63 = vmul.f32 1.442695, %v1722_v60  ;;  %v2025_v59 = vsel %vm1793_vm3, %v1322_v39, 0  ;;  %v1296_v60 = vadd.f32 %v2611_v43, %v3574_v52 }
 0x27f   :  { %v1745_v0 = vsel %vm1325_vm2, %v3141_v62, 0.0 }
 0x280   :  { %3146 = vpow2.f32 %v1736_v61  ;;  %1746 = vadd.xlane.f32.xlu1 %v1745_v0  ;;  %v1324_v0 = vpack.c.bf16 %v1296_v60, %v1296_v60 }
 0x281   :  { %3148 = vpow2.f32 %v1734_v63 }
 0x282   :  { %v3143_v2 = vpop.eup %3142 }
 0x283   :  { %v1717_v3 = vpop.xlane.xlu1 %1716  ;;  %v1714_v4 = vpop.xlane.xlu0 %1713  ;;  %v1748_v5 = vsel %vm1325_vm2, %v3143_v2, 0.0 }
 0x284   :  { %v1725_v6 = vsub.f32 %v1688_v24, %v1717_v3  ;;  %v1724_v47 = vsub.f32 %v1642_v23, %v1714_v4  ;;  %1749 = vadd.xlane.f32.xlu0 %v1748_v5  ;;  %v1112_v23 = vadd.f32 %v2609_v56, %v3566_v36  ;;  %v2117_v5 = vsel %vm1793_vm3, %v1324_v0, 0 }
 0x286   :  { %v3587_v7 = vpop.eup %3144  ;;  %v1740_v48 = vmul.f32 1.442695, %v1725_v6  ;;  %v1738_v8 = vmul.f32 1.442695, %v1724_v47  ;;  %v1320_v30 = vpack.c.bf16 %v1112_v23, %v1112_v23 }
 0x287   :  { %v1751_v9 = vsel %vm1325_vm2, %v3587_v7, 0.0 }
 0x288   :  { %3150 = vpow2.f32 %v1740_v48  ;;  %1752 = vadd.xlane.f32.xlu1 %v1751_v9  ;;  %v1933_v37 = vsel %vm1793_vm3, %v1320_v30, 0 }
 0x289   :  { %3152 = vpow2.f32 %v1738_v8  ;;  %v2167_v8 = vld [vmem:[%s3739_s9] sm:$0xf] }
 0x28a   :  { %v3591_v10 = vpop.eup %3146  ;;  %v2175_v9 = vsel %vm1793_vm3, %v2167_v8, 0 }
 0x28b   :  { %v3593_v11 = vpop.eup %3148  ;;  %v1757_v12 = vsel %vm1325_vm2, %v3591_v10, 0.0 }
 0x28c   :  { %1758 = vadd.xlane.f32.xlu1 %v1757_v12  ;;  %v1754_v13 = vsel %vm1325_vm2, %v3593_v11, 0.0 }
 0x28d   :  { %1755 = vadd.xlane.f32.xlu0 %v1754_v13 }
 0x292   :  { %v3599_v14 = vpop.eup %3150 }
 0x293   :  { %v3601_v15 = vpop.eup %3152  ;;  %v1763_v16 = vsel %vm1325_vm2, %v3599_v14, 0.0 }
 0x294   :  { %1764 = vadd.xlane.f32.xlu1 %v1763_v16  ;;  %v1760_v17 = vsel %vm1325_vm2, %v3601_v15, 0.0 }
 0x295   :  { %1761 = vadd.xlane.f32.xlu0 %v1760_v17 }
 0x309   :  { %v1744_v18 = vpop.xlane.xlu0 %1743 }
 0x30a   :  { %3154 = vrcp.f32 %v1744_v18 }
 0x30d   :  { %v1747_v55 = vpop.xlane.xlu1 %1746 }
 0x30e   :  { %3156 = vrcp.f32 %v1747_v55 }
 0x311   :  { %v1750_v20 = vpop.xlane.xlu0 %1749 }
 0x312   :  { %3158 = vrcp.f32 %v1750_v20 }
 0x314   :  { %v3155_v21 = vpop.eup %3154 }
 0x315   :  { %v1774_v24 = vmul.f32 %v3155_v21, %v3139_v51  ;;  %v1753_v25 = vpop.xlane.xlu1 %1752  ;;  %v1256_v51 = vadd.f32 %v2611_v43, %v3572_v40 }
 0x316   :  { %3160 = vrcp.f32 %v1753_v25 }
 0x317   :  { %v1782_v27 = vpack.c.bf16 %v1774_v24, %v1774_v24  ;;  %v2353_v24 = vsel %vm1793_vm3, %v2169_v19, 0 }
 0x318   :  { %v3157_v28 = vpop.eup %3156 }
 0x319   :  { %v1775_v33 = vmul.f32 %v3157_v28, %v3141_v62  ;;  %v1759_v31 = vpop.xlane.xlu1 %1758  ;;  %3016 = vmatmul.mubr.msk.bf16.vlgmr.msra.gmra.mrb[64].mxu0 %vm1325_vm2, %v1782_v27  ;;  %v1323_v62 = vpack.c.bf16 %v1256_v51, %v1256_v51 }
 0x31a   :  { %3162 = vrcp.f32 %v1759_v31  ;;  %3026 = vmatpush3.bf16.msra.mxu0 %v1887_v29  ;;  %v1756_v36 = vpop.xlane.xlu0 %1755  ;;  %3027 = vmatprep.mubr.msk.bf16.mxu0 %vm3195_vm0, %v3194_v1 }
 0x31b   :  { %3164 = vrcp.f32 %v1756_v36  ;;  %v1783_v32 = vpack.c.bf16 %v1775_v33, %v1775_v33  ;;  %3037 = vmatprep.subr.bf16.mxu0 %v3194_v1  ;;  %v2170_v33 = vld [vmem:[%s3739_s9 + $0xc] sm:$0xf] }
 0x31c   :  { %v3159_v35 = vpop.eup %3158 }
 0x31d   :  { %v1776_v41 = vmul.f32 %v3159_v35, %v3143_v2  ;;  %3022 = vmatmul.mubr.msk.bf16.vlgmr.msra.gmra.mrb[64].mxu1 %vm1325_vm2, %v1783_v32  ;;  %v2071_v2 = vsel %vm1793_vm3, %v1323_v62, 0  ;;  %v2442_v35 = vsel %vm1793_vm3, %v2170_v33, 0 }
 0x31e   :  { %3032 = vmatpush3.bf16.msra.mxu1 %v1933_v37  ;;  %3033 = vmatprep.mubr.msk.bf16.mxu1 %vm3195_vm0, %v3194_v1 }
 0x31f   :  { %v1784_v44 = vpack.c.bf16 %v1776_v41, %v1776_v41  ;;  %3043 = vmatprep.subr.bf16.mxu1 %v3194_v1 }
 0x320   :  { %v3161_v45 = vpop.eup %3160 }
 0x321   :  { %v1777_v46 = vmul.f32 %v3161_v45, %v3587_v7  ;;  %v1765_v50 = vpop.xlane.xlu1 %1764  ;;  %3028 = vmatmul.mubr.msk.bf16.vlgmr.msra.gmra.mrb[68].mxu0 %vm1325_vm2, %v1784_v44 }
 0x322   :  { %3166 = vrcp.f32 %v1765_v50  ;;  %3038 = vmatpush3.bf16.msra.mxu0 %v1979_v49  ;;  %v1762_v53 = vpop.xlane.xlu0 %1761  ;;  %3039 = vmatprep.mubr.msk.bf16.mxu0 %vm3195_vm0, %v3194_v1 }
 0x323   :  { %3168 = vrcp.f32 %v1762_v53  ;;  %v1785_v54 = vpack.c.bf16 %v1777_v46, %v1777_v46  ;;  %3049 = vmatprep.subr.bf16.mxu0 %v3194_v1 }
 0x324   :  { %v3163_v57 = vpop.eup %3162 }
 0x325   :  { %v3165_v58 = vpop.eup %3164  ;;  %3034 = vmatmul.mubr.msk.bf16.vlgmr.msra.gmra.mrb[68].mxu1 %vm1325_vm2, %v1785_v54  ;;  %v1779_v61 = vmul.f32 %v3163_v57, %v3591_v10  ;;  %v2168_v10 = vld [vmem:[%s3739_s9 + $0x4] sm:$0xf] }
 0x326   :  { %v1778_v40 = vmul.f32 %v3165_v58, %v3593_v11  ;;  %3044 = vmatpush3.bf16.msra.mxu1 %v2025_v59  ;;  %3045 = vmatprep.mubr.msk.bf16.mxu1 %vm3195_vm0, %v3194_v1 }
 0x327   :  { %3055 = vmatprep.subr.bf16.mxu1 %v3194_v1  ;;  %v1787_v52 = vpack.c.bf16 %v1779_v61, %v1779_v61 }
 0x328   :  { %v1786_v63 = vpack.c.bf16 %v1778_v40, %v1778_v40 }
 0x32a   :  { %3040 = vmatmul.mubr.msk.bf16.vlgmr.msra.gmra.mrb[72].mxu0 %vm1325_vm2, %v1786_v63 }
 0x32b   :  { %3050 = vmatpush3.bf16.msra.mxu0 %v2071_v2  ;;  %3051 = vmatprep.mubr.msk.bf16.mxu0 %vm3195_vm0, %v3194_v1 }
 0x32c   :  { %v3167_v3 = vpop.eup %3166  ;;  %3061 = vmatprep.subr.bf16.mxu0 %v3194_v1 }
 0x32d   :  { %v3169_v4 = vpop.eup %3168  ;;  %3046 = vmatmul.mubr.msk.bf16.vlgmr.msra.gmra.mrb[72].mxu1 %vm1325_vm2, %v1787_v52  ;;  %v1781_v47 = vmul.f32 %v3167_v3, %v3599_v14  ;;  %v2264_v14 = vsel %vm1793_vm3, %v2168_v10, 0 }
 0x32e   :  { %v1780_v6 = vmul.f32 %v3169_v4, %v3601_v15  ;;  %3056 = vmatpush3.bf16.msra.mxu1 %v2117_v5  ;;  %3057 = vmatprep.mubr.msk.bf16.mxu1 %vm3195_vm0, %v3194_v1 }
 0x32f   :  { %3067 = vmatprep.subr.bf16.mxu1 %v3194_v1  ;;  %v1789_v48 = vpack.c.bf16 %v1781_v47, %v1781_v47 }
 0x330   :  { %v1788_v7 = vpack.c.bf16 %v1780_v6, %v1780_v6 }
 0x332   :  { %3052 = vmatmul.mubr.msk.bf16.vlgmr.msra.gmra.mrb[76].mxu0 %vm1325_vm2, %v1788_v7 }
 0x333   :  { %3063 = vmatprep.mubr.msk.bf16.mxu0 %vm3195_vm0, %v3194_v1  ;;  %3062 = vmatpush3.bf16.msra.mxu0 %v2175_v9 }
 0x334   :  { %3073 = vmatprep.subr.bf16.mxu0 %v3194_v1 }
 0x335   :  { %3058 = vmatmul.mubr.msk.bf16.vlgmr.msra.gmra.mrb[76].mxu1 %vm1325_vm2, %v1789_v48 }
 0x336   :  { %3069 = vmatprep.mubr.msk.bf16.mxu1 %vm3195_vm0, %v3194_v1  ;;  %3068 = vmatpush3.bf16.msra.mxu1 %v2175_v9 }
 0x337   :  { %3079 = vmatprep.subr.bf16.mxu1 %v3194_v1 }
 0x3ec   :  { %v1831_v11 = vpop.f32.mrb[64].mxu0 }
 0x3ed   :  { %v2159_v12 = vpack.c.bf16 %v1831_v11, %v1831_v11  ;;  %v3017_v13 = vpop.f32.mrb[65].mxu0 }
 0x3ee   :  { %v1834_v15 = vpop.f32.mrb[66].mxu0 }
 0x3ef   :  { %v3018_v16 = vpop.f32.mrb[67].mxu0  ;;  %3064 = vmatmul.mubr.msk.bf16.vlgmr.msra.gmra.mrb[80].mxu0 %vm1325_vm2, %v2159_v12 }
 0x3f0   :  { %v1877_v17 = vpop.f32.mrb[64].mxu1  ;;  %3074 = vmatpush3.bf16.msra.mxu0 %v2264_v14  ;;  %3075 = vmatprep.mubr.msk.bf16.mxu0 %vm3195_vm0, %v3194_v1 }
 0x3f1   :  { %v2160_v18 = vpack.c.bf16 %v1877_v17, %v1877_v17  ;;  %v3023_v55 = vpop.f32.mrb[65].mxu1  ;;  %3085 = vmatprep.subr.bf16.mxu0 %v3194_v1 }
 0x3f2   :  { %v1880_v56 = vpop.f32.mrb[66].mxu1 }
 0x3f3   :  { %v3024_v20 = vpop.f32.mrb[67].mxu1  ;;  %3070 = vmatmul.mubr.msk.bf16.vlgmr.msra.gmra.mrb[80].mxu1 %vm1325_vm2, %v2160_v18 }
 0x3f4   :  { %v1923_v21 = vpop.f32.mrb[68].mxu0  ;;  %3080 = vmatpush3.bf16.msra.mxu1 %v2264_v14  ;;  %3081 = vmatprep.mubr.msk.bf16.mxu1 %vm3195_vm0, %v3194_v1 }
 0x3f5   :  { %v2161_v22 = vpack.c.bf16 %v1923_v21, %v1923_v21  ;;  %v3029_v23 = vpop.f32.mrb[69].mxu0  ;;  %3091 = vmatprep.subr.bf16.mxu1 %v3194_v1 }
 0x3f6   :  { %v1926_v25 = vpop.f32.mrb[70].mxu0 }
 0x3f7   :  { %v3030_v26 = vpop.f32.mrb[71].mxu0  ;;  %3076 = vmatmul.mubr.msk.bf16.vlgmr.msra.gmra.mrb[84].mxu0 %vm1325_vm2, %v2161_v22 }
 0x3f8   :  { %v1969_v27 = vpop.f32.mrb[68].mxu1  ;;  %3086 = vmatpush3.bf16.msra.mxu0 %v2353_v24  ;;  %3087 = vmatprep.mubr.msk.bf16.mxu0 %vm3195_vm0, %v3194_v1  ;;  %v2652_v26 = vld [vmem:[%s3740_s10] ss:$0 sm:$0xff]  ;;  %s3170_s10 = scalar_lea.vmem %s2558_s16, 256 }
 0x3f9   :  { %v2162_v28 = vpack.c.bf16 %v1969_v27, %v1969_v27  ;;  %v3035_v29 = vpop.f32.mrb[69].mxu1  ;;  %3097 = vmatprep.subr.bf16.mxu0 %v3194_v1  ;;  %p3171_p0 = scmp.ne.s32.totalorder %s2558_s16, %s3170_s10  ;;  %p3176_p2 = scmp.lt.s32.totalorder %s3170_s10, %s3170_s10 }
 0x3fa   :  { %v1972_v30 = vpop.f32.mrb[70].mxu1 }
 0x3fb   :  { %v3036_v34 = vpop.f32.mrb[71].mxu1  ;;  %3082 = vmatmul.mubr.msk.bf16.vlgmr.msra.gmra.mrb[84].mxu1 %vm1325_vm2, %v2162_v28  ;;  %p3177_p3 = por %p3176_p2, %p3175_p1 }
 0x3fc   :  { %3092 = vmatpush3.bf16.msra.mxu1 %v2353_v24  ;;  %3093 = vmatprep.mubr.msk.bf16.mxu1 %vm3195_vm0, %v3194_v1 }
 0x3fd   :  { %v2015_v31 = vpop.f32.mrb[72].mxu0  ;;  %3103 = vmatprep.subr.bf16.mxu1 %v3194_v1  ;;  %p3178_p4 = pnand %p3177_p3, %p3171_p0 }
 0x3fe   :  { %v2163_v36 = vpack.c.bf16 %v2015_v31, %v2015_v31  ;;  %v3041_v32 = vpop.f32.mrb[73].mxu0 }
 0x3ff   :  { %v2018_v37 = vpop.f32.mrb[74].mxu0 }
 0x400   :  { %v3042_v38 = vpop.f32.mrb[75].mxu0  ;;  %3088 = vmatmul.mubr.msk.bf16.vlgmr.msra.gmra.mrb[88].mxu0 %vm1325_vm2, %v2163_v36  ;;  %v2061_v42 = vpop.f32.mrb[72].mxu1 }
 0x401   :  { %v2164_v41 = vpack.c.bf16 %v2061_v42, %v2061_v42  ;;  %v3047_v43 = vpop.f32.mrb[73].mxu1  ;;  %3098 = vmatpush3.bf16.msra.mxu0 %v2442_v35  ;;  %3099 = vmatprep.mubr.msk.bf16.mxu0 %vm3195_vm0, %v3194_v1 }
 0x402   :  { %v2064_v44 = vpop.f32.mrb[74].mxu1 }
 0x403   :  { %v3048_v45 = vpop.f32.mrb[75].mxu1  ;;  %3094 = vmatmul.mubr.msk.bf16.vlgmr.msra.gmra.mrb[88].mxu1 %vm1325_vm2, %v2164_v41 }
 0x404   :  { %3104 = vmatpush3.bf16.msra.mxu1 %v2442_v35  ;;  %3105 = vmatprep.mubr.msk.bf16.mxu1 %vm3195_vm0, %v3194_v1 }
 0x405   :  { %v2107_v49 = vpop.f32.mrb[76].mxu0 }
 0x406   :  { %v2165_v39 = vpack.c.bf16 %v2107_v49, %v2107_v49  ;;  %v3053_v46 = vpop.f32.mrb[77].mxu0 }
 0x407   :  { %v2110_v50 = vpop.f32.mrb[78].mxu0 }
 0x408   :  { %v3054_v51 = vpop.f32.mrb[79].mxu0  ;;  %3100 = vmatmul.mubr.msk.bf16.vlgmr.msra.gmra.mrb[92].mxu0 %vm1325_vm2, %v2165_v39  ;;  %v2153_v53 = vpop.f32.mrb[76].mxu1 }
 0x409   :  { %v2166_v54 = vpack.c.bf16 %v2153_v53, %v2153_v53  ;;  %v3059_v57 = vpop.f32.mrb[77].mxu1 }
 0x40a   :  { %v2156_v58 = vpop.f32.mrb[78].mxu1 }
 0x40b   :  { %v3060_v59 = vpop.f32.mrb[79].mxu1  ;;  %3106 = vmatmul.mubr.msk.bf16.vlgmr.msra.gmra.mrb[92].mxu1 %vm1325_vm2, %v2166_v54 }
 0x4c2   :  { %v2211_v60 = vpop.f32.mrb[80].mxu0 }
 0x4c3   :  { %v3065_v62 = vpop.f32.mrb[81].mxu0  ;;  %v2527_v3 = vsel %vm102_vm1, %v2211_v60, 0.0 }
 0x4c4   :  { %v2214_v40 = vpop.f32.mrb[82].mxu0 }
 0x4c5   :  { %v3066_v61 = vpop.f32.mrb[83].mxu0 }
 0x4c6   :  { %v2254_v63 = vpop.f32.mrb[80].mxu1 }
 0x4c7   :  { %v3071_v1 = vpop.f32.mrb[81].mxu1  ;;  %v2534_v8 = vsel %vm102_vm1, %v2254_v63, 0.0 }
 0x4c8   :  { %v2257_v0 = vpop.f32.mrb[82].mxu1 }
 0x4c9   :  { %v3072_v2 = vpop.f32.mrb[83].mxu1 }
 0x4ca   :  { %v2300_v52 = vpop.f32.mrb[84].mxu0 }
 0x4cb   :  { %v2528_v4 = vsel %vm102_vm1, %v2300_v52, 0.0  ;;  %v3077_v5 = vpop.f32.mrb[85].mxu0 }
 0x4cc   :  { %v2529_v6 = vadd.f32 %v2528_v4, %v2527_v3  ;;  %v2303_v47 = vpop.f32.mrb[86].mxu0 }
 0x4cd   :  { %v3078_v7 = vpop.f32.mrb[87].mxu0 }
 0x4ce   :  { %v2343_v48 = vpop.f32.mrb[84].mxu1 }
 0x4cf   :  { %v2535_v9 = vsel %vm102_vm1, %v2343_v48, 0.0  ;;  %v3083_v10 = vpop.f32.mrb[85].mxu1 }
 0x4d0   :  { %v2536_v11 = vadd.f32 %v2535_v9, %v2534_v8  ;;  %v2346_v12 = vpop.f32.mrb[86].mxu1 }
 0x4d1   :  { %v3084_v13 = vpop.f32.mrb[87].mxu1 }
 0x4d3   :  { %v2389_v14 = vpop.f32.mrb[88].mxu0 }
 0x4d4   :  { %v2530_v15 = vsel %vm102_vm1, %v2389_v14, 0.0  ;;  %v3089_v16 = vpop.f32.mrb[89].mxu0 }
 0x4d5   :  { %v2531_v17 = vadd.f32 %v2530_v15, %v2529_v6  ;;  %v2392_v18 = vpop.f32.mrb[90].mxu0 }
 0x4d6   :  { %v3090_v55 = vpop.f32.mrb[91].mxu0  ;;  %v2432_v56 = vpop.f32.mrb[88].mxu1 }
 0x4d7   :  { %v2537_v19 = vsel %vm102_vm1, %v2432_v56, 0.0  ;;  %v3095_v20 = vpop.f32.mrb[89].mxu1 }
 0x4d8   :  { %v2538_v21 = vadd.f32 %v2537_v19, %v2536_v11  ;;  %v2435_v22 = vpop.f32.mrb[90].mxu1 }
 0x4d9   :  { %v3096_v23 = vpop.f32.mrb[91].mxu1 }
 0x4db   :  { %v2478_v24 = vpop.f32.mrb[92].mxu0 }
 0x4dc   :  { %v2532_v25 = vsel %vm102_vm1, %v2478_v24, 0.0  ;;  %v3101_v27 = vpop.f32.mrb[93].mxu0 }
 0x4dd   :  { %v2533_v28 = vadd.f32 %v2532_v25, %v2531_v17  ;;  %v2481_v29 = vpop.f32.mrb[94].mxu0 }
 0x4de   :  { %v3102_v30 = vpop.f32.mrb[95].mxu0  ;;  %v2521_v34 = vpop.f32.mrb[92].mxu1 }
 0x4df   :  { %v2548_v33 = vadd.f32 %v2652_v26, %v2533_v28  ;;  %v2539_v31 = vsel %vm102_vm1, %v2521_v34, 0.0  ;;  %v3107_v36 = vpop.f32.mrb[93].mxu1 }
 0x4e0   :  { %v2540_v32 = vadd.f32 %v2539_v31, %v2538_v21  ;;  %v2524_v35 = vpop.f32.mrb[94].mxu1 }
 0x4e1   :  { %2550 = vst.msk [vmem:[#allocation2] sm:$0xff] %vm102_vm1, %v2548_v33  ;;  %v3108_v37 = vpop.f32.mrb[95].mxu1 }
 0x4e2   :  { %v2549_v38 = vadd.f32 %v2652_v26, %v2540_v32 }
 0x4e4   :  { %2551 = vst.msk [vmem:[#allocation2 + $0x8] sm:$0xff] %vm102_vm1, %v2549_v38 }
 0x4e5   :  { %3181 = shalt.err (!%p3178_p4)
}
 0x4e6   :  { %s3182_s18 = scalar_lea.hbm %s3741_s11, 256 }
 0x4e7   :  { %p3183_p5 = scmp.ne.s32.totalorder %s3741_s11, %s3182_s18  ;;  %p3186_p6 = scmp.lt.u32.totalorder %s3182_s18, %s3741_s11 }
 0x4e9   :  { %p3188_p7 = pnand %p3186_p6, %p3183_p5 }
 0x4eb   :  { %3191 = shalt.err (!%p3188_p7)
}
 0x4ec   :  { %s3197_s6 = smov 128   ;;  %s3198_s22 = smov 8  }
 0x4ed   :  { %2563 = dma.vmem_to_hbm [thread:$0]  %s2558_s16, 256, %s3741_s11, [#allocation3], %s3197_s6, %s3197_s6, %s3198_s22  }
 0x4ee   :  { %3192 = dma.done.wait [#allocation3], 256  }
 0x4ef   :  { %3193 = vsyncadd [#allocation3], 4294967040 }
 0x4f0   :  { %2567 = vsyncpa [#allocation3], 1 }

</bundles_post_ra>
